<compile_context>
chip_gen: v7x
topology: tpu7x:2x2x1
jax: 0.10.0
libtpu: 0.0.40
codegen_flags: <defaults>
</compile_context>

<pallas_src>
import math

import jax
import jax.numpy as jnp
import numpy as np
from jax.experimental import pallas as pl
from jax.experimental.pallas import tpu as pltpu

_VMEM_BUDGET = 48 * 1024 * 1024   # conservative scoped-VMEM budget (fits v7x's 64 MiB)


# ----------------------------------------------------------------------------
# Fused kernel: time-blocked LSTM recurrence + output head (Linear + Sigmoid).
# ----------------------------------------------------------------------------
def _fused_lstm_kernel(x_ref, wih_ref, whh_ref, b_ref, wout_ref, bo_ref,
                       o_ref, xg_sc, h_sc, c_sc):
    tblk = pl.program_id(1)

    @pl.when(tblk == 0)
    def _():
        # init_states=None in the PyTorch module -> zeros at sequence start
        h_sc[...] = jnp.zeros_like(h_sc)
        c_sc[...] = jnp.zeros_like(c_sc)

    Tb, Bb, D = x_ref.shape
    H = h_sc.shape[-1]
    n_q = bo_ref.shape[-1]

    # ---- batched input projection for the whole time block --------------------
    # One big MXU matmul off the serial critical path; staged in VMEM scratch so
    # it is NOT live in vregs across the unrolled recurrence (bounds live ranges).
    x_blk = x_ref[...].reshape(Tb * Bb, D)                       # bf16, (t, b) rows
    xg_sc[...] = (jnp.dot(x_blk, wih_ref[...],
                          preferred_element_type=jnp.float32)
                  + b_ref[...])                                   # f32 (Tb*Bb, 4H)

    whh = whh_ref[...]        # (H, 4H)  bf16
    wout = wout_ref[...]      # (H, n_q) bf16
    bo = bo_ref[...]          # (1, n_q) f32
    h = h_sc[...]             # f32 state
    c = c_sc[...]

    # ---- recurrence: one small (Bb,H)@(H,4H) matmul per step on the serial path.
    # Static unroll (Tb is capped at 32 by the block chooser); only h/c are live
    # across iterations since the projected gates live in VMEM scratch.
    # TODO(synk): keep W_hh resident in the MXU across the block with
    # pltpu.matmul_push_rhs / matmul_acc_lhs / matmul_pop (perf-review opt 3).
    for t in range(Tb):
        gates = (jnp.dot(h.astype(whh.dtype), whh,
                         preferred_element_type=jnp.float32)
                 + xg_sc[t * Bb:(t + 1) * Bb, :])                 # (Bb, 4H) f32
        if H % 128 == 0:
            # lane-dense slices: only 4H lanes of EUP work per step
            if_g = jax.nn.sigmoid(gates[:, :2 * H])
            i_g, f_g = if_g[:, :H], if_g[:, H:]
            g_g = jnp.tanh(gates[:, 2 * H:3 * H])
            o_g = jax.nn.sigmoid(gates[:, 3 * H:])
        else:
            # sub-vreg H: full-width sigmoid+tanh then slice (no masking needed)
            sig = jax.nn.sigmoid(gates)
            tnh = jnp.tanh(gates)
            i_g, f_g = sig[:, :H], sig[:, H:2 * H]
            o_g = sig[:, 3 * H:]
            g_g = tnh[:, 2 * H:3 * H]
        c = f_g * c + i_g * g_g
        h = o_g * jnp.tanh(c)

        # Fused output head for this step.  Independent of the h->h chain, so it
        # overlaps with the next step's recurrence matmul.  Written at a static
        # lane offset into the lane-dense (Bb, Tb*n_q) output block in VMEM; the
        # HBM writeback is one dense slab per grid step.
        logits = (jnp.dot(h.astype(wout.dtype), wout,
                          preferred_element_type=jnp.float32) + bo)
        o_ref[:, t * n_q:(t + 1) * n_q] = jax.nn.sigmoid(logits).astype(o_ref.dtype)

    h_sc[...] = h
    c_sc[...] = c


# ----------------------------------------------------------------------------
# Block-size selection: lane-dense fused output + VMEM budget.
# ----------------------------------------------------------------------------
def _choose_blocks(B, T, D, H, n_q):
    b_pad8 = -(-B // 8) * 8
    Bb = b_pad8 if b_pad8 <= 256 else 256

    step = 128 // math.gcd(128, n_q)          # Tb multiple of step => Tb*n_q % 128 == 0
    if step <= 32:
        Tb = step * max(1, min(32 // step, -(-T // step)))   # cap static unroll at 32
    else:
        # lane density forces a big unroll (awkward n_q); rare
        # TODO(synk): group-wise unroll for very large `step`
        Tb = step

    def vmem_need(bb, tb):
        x_bytes = 2 * tb * bb * D * 2          # double-buffered bf16 input block
        out_bytes = 2 * bb * tb * n_q * 4      # double-buffered f32 output block
        xg_bytes = tb * bb * 4 * H * 4         # f32 projection scratch
        state_bytes = 2 * bb * H * 4
        w_bytes = (D * 4 * H + H * 4 * H + H * n_q) * 2 + (4 * H + n_q) * 4
        return x_bytes + out_bytes + xg_bytes + state_bytes + w_bytes

    while vmem_need(Bb, Tb) > _VMEM_BUDGET and Bb > 8:
        Bb = max(8, (Bb // 16) * 8)            # halve, keep multiple of 8
    while vmem_need(Bb, Tb) > _VMEM_BUDGET and Tb > step:
        Tb -= step
    return Bb, Tb


# ----------------------------------------------------------------------------
# Wrapper: weight prep, padding, pallas_call.
# ----------------------------------------------------------------------------
def lstm_model_forward(x, w_ih, w_hh, b_ih, b_hh, w_out, b_out, basis=None):
    """Pallas forward pass matching LSTMModel.forward (init_states=None, eval mode).

    x:      (B, T, 2*n_questions)  float32
    w_ih:   (4H, n_input)  w_hh: (4H, H)  b_ih/b_hh: (4H,)
    w_out:  (n_questions, H)  b_out: (n_questions,)
    basis:  optional (2*n_questions, n_input) compressed-sensing projection.
    """
    B, T, _ = x.shape
    H = w_hh.shape[1]
    n_q = w_out.shape[0]

    # --- weight prep (all folds happen once, outside the kernel) --------------
    wih_t = w_ih.T.astype(jnp.float32)                       # (n_input, 4H)
    if basis is not None:
        # fold compressed sensing: (x @ basis) @ W_ih^T == x @ (basis @ W_ih^T)
        wih_t = basis.astype(jnp.float32) @ wih_t             # (2*n_q, 4H)
    D = wih_t.shape[0]
    whh_t = w_hh.T.astype(jnp.float32)                        # (H, 4H)
    b = (b_ih + b_hh).reshape(1, 4 * H).astype(jnp.float32)   # (1, 4H)
    wout_t = w_out.T.astype(jnp.float32)                      # (H, n_q)
    bo = b_out.reshape(1, n_q).astype(jnp.float32)            # (1, n_q)

    # bf16 MXU operands; f32 accumulation and f32 gate/state math stay in-kernel
    wih_bf = wih_t.astype(jnp.bfloat16)
    whh_bf = whh_t.astype(jnp.bfloat16)
    wout_bf = wout_t.astype(jnp.bfloat16)

    Bb, Tb = _choose_blocks(B, T, D, H, n_q)
    B_pad = -(-B // Bb) * Bb
    T_pad = -(-T // Tb) * Tb

    # TODO(synk): time-major transpose of x here is one extra XLA pass over the
    # input (review opt 12); kept for a simple aligned per-step gate slice.
    x_tbd = jnp.transpose(x, (1, 0, 2)).astype(jnp.bfloat16)          # (T, B, D)
    x_pad = jnp.pad(x_tbd, ((0, T_pad - T), (0, B_pad - B), (0, 0)))  # (T_pad, B_pad, D)

    out_flat = pl.pallas_call(
        _fused_lstm_kernel,
        out_shape=jax.ShapeDtypeStruct((B_pad, T_pad * n_q), jnp.float32),
        grid_spec=pltpu.PrefetchScalarGridSpec(
            num_scalar_prefetch=0,
            grid=(B_pad // Bb, T_pad // Tb),       # (batch blocks, time blocks)
            in_specs=[
                pl.BlockSpec((Tb, Bb, D), lambda i, j: (j, i, 0)),   # x block
                pl.BlockSpec(wih_bf.shape, lambda i, j: (0, 0)),     # W_ih^T (basis-folded)
                pl.BlockSpec(whh_bf.shape, lambda i, j: (0, 0)),     # W_hh^T
                pl.BlockSpec(b.shape, lambda i, j: (0, 0)),          # b_ih + b_hh
                pl.BlockSpec(wout_bf.shape, lambda i, j: (0, 0)),    # W_out^T
                pl.BlockSpec(bo.shape, lambda i, j: (0, 0)),         # b_out
            ],
            out_specs=pl.BlockSpec((Bb, Tb * n_q), lambda i, j: (i, j)),
            scratch_shapes=[
                pltpu.VMEM((Tb * Bb, 4 * H), jnp.float32),   # staged input projection
                pltpu.VMEM((Bb, H), jnp.float32),            # h state
                pltpu.VMEM((Bb, H), jnp.float32),            # c state
            ],
        ),
        compiler_params=pltpu.CompilerParams(
            dimension_semantics=("parallel", "arbitrary"),   # batch || , time sequential
            vmem_limit_bytes=_VMEM_BUDGET,
        ),
    )(x_pad, wih_bf, whh_bf, b, wout_bf, bo)

    # out_flat[b, t*n_q + q] already has the (batch, time, question) order:
    # a free reshape, no transpose, then slice off the padding.
    return out_flat.reshape(B_pad, T_pad, n_q)[:B, :T]


# ----------------------------------------------------------------------------
# Pure-JAX reference (mirrors the PyTorch semantics in f32).
# ----------------------------------------------------------------------------
def reference_forward(x, w_ih, w_hh, b_ih, b_hh, w_out, b_out, basis=None):
    if basis is not None:
        x = x @ basis
    B, _, _ = x.shape
    H = w_hh.shape[1]

    def step(carry, x_t):
        h, c = carry
        gates = x_t @ w_ih.T + h @ w_hh.T + b_ih + b_hh
        i, f, g, o = jnp.split(gates, 4, axis=-1)
        i, f, o = jax.nn.sigmoid(i), jax.nn.sigmoid(f), jax.nn.sigmoid(o)
        g = jnp.tanh(g)
        c = f * c + i * g
        h = o * jnp.tanh(c)
        return (h, c), h

    h0 = jnp.zeros((B, H), jnp.float32)
    c0 = jnp.zeros((B, H), jnp.float32)
    (_, _), hs = jax.lax.scan(step, (h0, c0), jnp.transpose(x, (1, 0, 2)))
    hs = jnp.transpose(hs, (1, 0, 2))
    return jax.nn.sigmoid(hs @ w_out.T + b_out)


if __name__ == "__main__":
    # module params (small, consistent with the forward):
    n_questions = 16
    n_hidden = 32
    compressed_sensing = True
    compressed_dim = 20
    batch, seq = 2, 8
    n_raw = 2 * n_questions                 # 32
    n_input = compressed_dim if compressed_sensing else n_raw

    key = jax.random.PRNGKey(0)
    ks = jax.random.split(key, 8)
    x = jax.random.normal(ks[0], (batch, seq, n_raw), dtype=jnp.float32)

    scale = 0.1
    w_ih = scale * jax.random.normal(ks[1], (4 * n_hidden, n_input), dtype=jnp.float32)
    w_hh = scale * jax.random.normal(ks[2], (4 * n_hidden, n_hidden), dtype=jnp.float32)
    b_ih = scale * jax.random.normal(ks[3], (4 * n_hidden,), dtype=jnp.float32)
    b_hh = scale * jax.random.normal(ks[4], (4 * n_hidden,), dtype=jnp.float32)
    w_out = scale * jax.random.normal(ks[5], (n_questions, n_hidden), dtype=jnp.float32)
    b_out = scale * jax.random.normal(ks[6], (n_questions,), dtype=jnp.float32)
    basis = (jax.random.normal(ks[7], (n_raw, n_input), dtype=jnp.float32)
             if compressed_sensing else None)

    out = lstm_model_forward(x, w_ih, w_hh, b_ih, b_hh, w_out, b_out, basis=basis)
    out = jax.block_until_ready(out)
    assert out.shape == (batch, seq, n_questions)

    ref = reference_forward(x, w_ih, w_hh, b_ih, b_hh, w_out, b_out, basis=basis)
    # bf16 MXU operands (f32 accumulation) vs an all-f32 reference -> 2e-2 tolerance
    np.testing.assert_allclose(np.asarray(out), np.asarray(ref), atol=2e-2, rtol=2e-2)

    print("KERNEL_OK")
</pallas_src>

<mosaic_0001>
module attributes {stable_mosaic.version = 11 : i64} {
  func.func @_fused_lstm_kernel(%arg0: i32, %arg1: i32, %arg2: memref<8x8x32xbf16, #tpu.memory_space<vmem>>, %arg3: memref<32x128xbf16, #tpu.memory_space<vmem>>, %arg4: memref<32x128xbf16, #tpu.memory_space<vmem>>, %arg5: memref<1x128xf32, #tpu.memory_space<vmem>>, %arg6: memref<32x16xbf16, #tpu.memory_space<vmem>>, %arg7: memref<1x16xf32, #tpu.memory_space<vmem>>, %arg8: memref<8x128xf32, #tpu.memory_space<vmem>>, %arg9: memref<64x128xf32, #tpu.memory_space<vmem>>, %arg10: memref<8x32xf32, #tpu.memory_space<vmem>>, %arg11: memref<8x32xf32, #tpu.memory_space<vmem>>) attributes {dimension_semantics = [#tpu.dimension_semantics<parallel>, #tpu.dimension_semantics<arbitrary>], iteration_bounds = array<i64: 1, 1>, scalar_prefetch = 0 : i64, scratch_operands = 3 : i64, tpu.core_type = #tpu.core_type<tc>, window_params = [{transform_indices = @transform_0, window_bounds = array<i64: 8, 8, 32>}, {pipeline_mode = #tpu.pipeline_mode<synchronous>, transform_indices = @transform_1, window_bounds = array<i64: 32, 128>}, {pipeline_mode = #tpu.pipeline_mode<synchronous>, transform_indices = @transform_2, window_bounds = array<i64: 32, 128>}, {pipeline_mode = #tpu.pipeline_mode<synchronous>, transform_indices = @transform_3, window_bounds = array<i64: 1, 128>}, {pipeline_mode = #tpu.pipeline_mode<synchronous>, transform_indices = @transform_4, window_bounds = array<i64: 32, 16>}, {pipeline_mode = #tpu.pipeline_mode<synchronous>, transform_indices = @transform_5, window_bounds = array<i64: 1, 16>}, {transform_indices = @transform_6, window_bounds = array<i64: 8, 128>}]} {
    %c0_i32 = arith.constant 0 : i32
    %0 = arith.cmpi eq, %arg1, %c0_i32 : i32
    %1 = arith.extui %0 : i1 to i32
    %c0_i32_0 = arith.constant 0 : i32
    %2 = arith.cmpi ne, %1, %c0_i32_0 : i32
    scf.if %2 {
      %cst_76 = arith.constant 0.000000e+00 : f32
      %250 = vector.broadcast %cst_76 : f32 to vector<8x32xf32>
      %c0_77 = arith.constant 0 : index
      %c0_78 = arith.constant 0 : index
      %251 = vector.load %arg10[%c0_77, %c0_78] : memref<8x32xf32, #tpu.memory_space<vmem>>, vector<8x32xf32>
      tpu.vector_store %arg10[%c0_77, %c0_78], %250 {strides = array<i32>} : memref<8x32xf32, #tpu.memory_space<vmem>>, vector<8x32xf32>,
      %cst_79 = arith.constant 0.000000e+00 : f32
      %252 = vector.broadcast %cst_79 : f32 to vector<8x32xf32>
      %c0_80 = arith.constant 0 : index
      %c0_81 = arith.constant 0 : index
      %253 = vector.load %arg11[%c0_80, %c0_81] : memref<8x32xf32, #tpu.memory_space<vmem>>, vector<8x32xf32>
      tpu.vector_store %arg11[%c0_80, %c0_81], %252 {strides = array<i32>} : memref<8x32xf32, #tpu.memory_space<vmem>>, vector<8x32xf32>,
    } else {
    }
    %c0 = arith.constant 0 : index
    %c0_1 = arith.constant 0 : index
    %c0_2 = arith.constant 0 : index
    %3 = vector.load %arg2[%c0, %c0_1, %c0_2] : memref<8x8x32xbf16, #tpu.memory_space<vmem>>, vector<8x8x32xbf16>
    %4 = vector.shape_cast %3 : vector<8x8x32xbf16> to vector<64x32xbf16>
    %c0_3 = arith.constant 0 : index
    %c0_4 = arith.constant 0 : index
    %5 = vector.load %arg3[%c0_3, %c0_4] : memref<32x128xbf16, #tpu.memory_space<vmem>>, vector<32x128xbf16>
    %cst = arith.constant dense<0.000000e+00> : vector<64x128xf32>
    %6 = tpu.matmul %4, %5, %cst {dimension_numbers = #tpu.dot_dimension_numbers<[1], [0], [0], [1], [0, 0, 1, 1], [], []>} : vector<64x32xbf16>, vector<32x128xbf16>, vector<64x128xf32> -> vector<64x128xf32>
    %c0_5 = arith.constant 0 : index
    %c0_6 = arith.constant 0 : index
    %7 = vector.load %arg5[%c0_5, %c0_6] : memref<1x128xf32, #tpu.memory_space<vmem>>, vector<1x128xf32>
    %8 = vector.broadcast %7 : vector<1x128xf32> to vector<64x128xf32>
    %9 = arith.addf %6, %8 : vector<64x128xf32>
    %c0_7 = arith.constant 0 : index
    %c0_8 = arith.constant 0 : index
    %10 = vector.load %arg9[%c0_7, %c0_8] : memref<64x128xf32, #tpu.memory_space<vmem>>, vector<64x128xf32>
    tpu.vector_store %arg9[%c0_7, %c0_8], %9 {strides = array<i32>} : memref<64x128xf32, #tpu.memory_space<vmem>>, vector<64x128xf32>,
    %c0_9 = arith.constant 0 : index
    %c0_10 = arith.constant 0 : index
    %11 = vector.load %arg4[%c0_9, %c0_10] : memref<32x128xbf16, #tpu.memory_space<vmem>>, vector<32x128xbf16>
    %c0_11 = arith.constant 0 : index
    %c0_12 = arith.constant 0 : index
    %12 = vector.load %arg6[%c0_11, %c0_12] : memref<32x16xbf16, #tpu.memory_space<vmem>>, vector<32x16xbf16>
    %c0_13 = arith.constant 0 : index
    %c0_14 = arith.constant 0 : index
    %13 = vector.load %arg7[%c0_13, %c0_14] : memref<1x16xf32, #tpu.memory_space<vmem>>, vector<1x16xf32>
    %c0_15 = arith.constant 0 : index
    %c0_16 = arith.constant 0 : index
    %14 = vector.load %arg10[%c0_15, %c0_16] : memref<8x32xf32, #tpu.memory_space<vmem>>, vector<8x32xf32>
    %c0_17 = arith.constant 0 : index
    %c0_18 = arith.constant 0 : index
    %15 = vector.load %arg11[%c0_17, %c0_18] : memref<8x32xf32, #tpu.memory_space<vmem>>, vector<8x32xf32>
    %16 = arith.truncf %14 : vector<8x32xf32> to vector<8x32xbf16>
    %cst_19 = arith.constant dense<0.000000e+00> : vector<8x128xf32>
    %17 = tpu.matmul %16, %11, %cst_19 {dimension_numbers = #tpu.dot_dimension_numbers<[1], [0], [0], [1], [0, 0, 1, 1], [], []>} : vector<8x32xbf16>, vector<32x128xbf16>, vector<8x128xf32> -> vector<8x128xf32>
    %c0_20 = arith.constant 0 : index
    %c0_21 = arith.constant 0 : index
    %18 = vector.load %arg9[%c0_20, %c0_21] : memref<64x128xf32, #tpu.memory_space<vmem>>, vector<8x128xf32>
    %19 = arith.addf %17, %18 : vector<8x128xf32>
    %20 = arith.negf %19 : vector<8x128xf32>
    %21 = math.exp %20 : vector<8x128xf32>
    %cst_22 = arith.constant 1.000000e+00 : f32
    %22 = vector.broadcast %cst_22 : f32 to vector<8x128xf32>
    %23 = arith.addf %22, %21 : vector<8x128xf32>
    %24 = arith.divf %22, %23 : vector<8x128xf32>
    %25 = math.tanh %19 : vector<8x128xf32>
    %26 = vector.extract_strided_slice %24 {offsets = [0, 0], sizes = [8, 32], strides = [1, 1]} : vector<8x128xf32> to vector<8x32xf32>
    %27 = vector.extract_strided_slice %24 {offsets = [0, 32], sizes = [8, 32], strides = [1, 1]} : vector<8x128xf32> to vector<8x32xf32>
    %28 = vector.extract_strided_slice %24 {offsets = [0, 96], sizes = [8, 32], strides = [1, 1]} : vector<8x128xf32> to vector<8x32xf32>
    %29 = vector.extract_strided_slice %25 {offsets = [0, 64], sizes = [8, 32], strides = [1, 1]} : vector<8x128xf32> to vector<8x32xf32>
    %30 = arith.mulf %27, %15 : vector<8x32xf32>
    %31 = arith.mulf %26, %29 : vector<8x32xf32>
    %32 = arith.addf %30, %31 : vector<8x32xf32>
    %33 = math.tanh %32 : vector<8x32xf32>
    %34 = arith.mulf %28, %33 : vector<8x32xf32>
    %35 = arith.truncf %34 : vector<8x32xf32> to vector<8x32xbf16>
    %cst_23 = arith.constant dense<0.000000e+00> : vector<8x16xf32>
    %36 = tpu.matmul %35, %12, %cst_23 {dimension_numbers = #tpu.dot_dimension_numbers<[1], [0], [0], [1], [0, 0, 1, 1], [], []>} : vector<8x32xbf16>, vector<32x16xbf16>, vector<8x16xf32> -> vector<8x16xf32>
    %37 = vector.broadcast %13 : vector<1x16xf32> to vector<8x16xf32>
    %38 = arith.addf %36, %37 : vector<8x16xf32>
    %39 = arith.negf %38 : vector<8x16xf32>
    %40 = math.exp %39 : vector<8x16xf32>
    %cst_24 = arith.constant 1.000000e+00 : f32
    %41 = vector.broadcast %cst_24 : f32 to vector<8x16xf32>
    %42 = arith.addf %41, %40 : vector<8x16xf32>
    %43 = arith.divf %41, %42 : vector<8x16xf32>
    %c0_25 = arith.constant 0 : index
    %c0_26 = arith.constant 0 : index
    %44 = vector.load %arg8[%c0_25, %c0_26] : memref<8x128xf32, #tpu.memory_space<vmem>>, vector<8x16xf32>
    tpu.vector_store %arg8[%c0_25, %c0_26], %43 {strides = array<i32>} : memref<8x128xf32, #tpu.memory_space<vmem>>, vector<8x16xf32>,
    %45 = arith.truncf %34 : vector<8x32xf32> to vector<8x32xbf16>
    %cst_27 = arith.constant dense<0.000000e+00> : vector<8x128xf32>
    %46 = tpu.matmul %45, %11, %cst_27 {dimension_numbers = #tpu.dot_dimension_numbers<[1], [0], [0], [1], [0, 0, 1, 1], [], []>} : vector<8x32xbf16>, vector<32x128xbf16>, vector<8x128xf32> -> vector<8x128xf32>
    %c8 = arith.constant 8 : index
    %c0_28 = arith.constant 0 : index
    %47 = vector.load %arg9[%c8, %c0_28] : memref<64x128xf32, #tpu.memory_space<vmem>>, vector<8x128xf32>
    %48 = arith.addf %46, %47 : vector<8x128xf32>
    %49 = arith.negf %48 : vector<8x128xf32>
    %50 = math.exp %49 : vector<8x128xf32>
    %cst_29 = arith.constant 1.000000e+00 : f32
    %51 = vector.broadcast %cst_29 : f32 to vector<8x128xf32>
    %52 = arith.addf %51, %50 : vector<8x128xf32>
    %53 = arith.divf %51, %52 : vector<8x128xf32>
    %54 = math.tanh %48 : vector<8x128xf32>
    %55 = vector.extract_strided_slice %53 {offsets = [0, 0], sizes = [8, 32], strides = [1, 1]} : vector<8x128xf32> to vector<8x32xf32>
    %56 = vector.extract_strided_slice %53 {offsets = [0, 32], sizes = [8, 32], strides = [1, 1]} : vector<8x128xf32> to vector<8x32xf32>
    %57 = vector.extract_strided_slice %53 {offsets = [0, 96], sizes = [8, 32], strides = [1, 1]} : vector<8x128xf32> to vector<8x32xf32>
    %58 = vector.extract_strided_slice %54 {offsets = [0, 64], sizes = [8, 32], strides = [1, 1]} : vector<8x128xf32> to vector<8x32xf32>
    %59 = arith.mulf %56, %32 : vector<8x32xf32>
    %60 = arith.mulf %55, %58 : vector<8x32xf32>
    %61 = arith.addf %59, %60 : vector<8x32xf32>
    %62 = math.tanh %61 : vector<8x32xf32>
    %63 = arith.mulf %57, %62 : vector<8x32xf32>
    %64 = arith.truncf %63 : vector<8x32xf32> to vector<8x32xbf16>
    %cst_30 = arith.constant dense<0.000000e+00> : vector<8x16xf32>
    %65 = tpu.matmul %64, %12, %cst_30 {dimension_numbers = #tpu.dot_dimension_numbers<[1], [0], [0], [1], [0, 0, 1, 1], [], []>} : vector<8x32xbf16>, vector<32x16xbf16>, vector<8x16xf32> -> vector<8x16xf32>
    %66 = vector.broadcast %13 : vector<1x16xf32> to vector<8x16xf32>
    %67 = arith.addf %65, %66 : vector<8x16xf32>
    %68 = arith.negf %67 : vector<8x16xf32>
    %69 = math.exp %68 : vector<8x16xf32>
    %cst_31 = arith.constant 1.000000e+00 : f32
    %70 = vector.broadcast %cst_31 : f32 to vector<8x16xf32>
    %71 = arith.addf %70, %69 : vector<8x16xf32>
    %72 = arith.divf %70, %71 : vector<8x16xf32>
    %c0_32 = arith.constant 0 : index
    %c16 = arith.constant 16 : index
    %73 = vector.load %arg8[%c0_32, %c16] : memref<8x128xf32, #tpu.memory_space<vmem>>, vector<8x16xf32>
    tpu.vector_store %arg8[%c0_32, %c16], %72 {strides = array<i32>} : memref<8x128xf32, #tpu.memory_space<vmem>>, vector<8x16xf32>,
    %74 = arith.truncf %63 : vector<8x32xf32> to vector<8x32xbf16>
    %cst_33 = arith.constant dense<0.000000e+00> : vector<8x128xf32>
    %75 = tpu.matmul %74, %11, %cst_33 {dimension_numbers = #tpu.dot_dimension_numbers<[1], [0], [0], [1], [0, 0, 1, 1], [], []>} : vector<8x32xbf16>, vector<32x128xbf16>, vector<8x128xf32> -> vector<8x128xf32>
    %c16_34 = arith.constant 16 : index
    %c0_35 = arith.constant 0 : index
    %76 = vector.load %arg9[%c16_34, %c0_35] : memref<64x128xf32, #tpu.memory_space<vmem>>, vector<8x128xf32>
    %77 = arith.addf %75, %76 : vector<8x128xf32>
    %78 = arith.negf %77 : vector<8x128xf32>
    %79 = math.exp %78 : vector<8x128xf32>
    %cst_36 = arith.constant 1.000000e+00 : f32
    %80 = vector.broadcast %cst_36 : f32 to vector<8x128xf32>
    %81 = arith.addf %80, %79 : vector<8x128xf32>
    %82 = arith.divf %80, %81 : vector<8x128xf32>
    %83 = math.tanh %77 : vector<8x128xf32>
    %84 = vector.extract_strided_slice %82 {offsets = [0, 0], sizes = [8, 32], strides = [1, 1]} : vector<8x128xf32> to vector<8x32xf32>
    %85 = vector.extract_strided_slice %82 {offsets = [0, 32], sizes = [8, 32], strides = [1, 1]} : vector<8x128xf32> to vector<8x32xf32>
    %86 = vector.extract_strided_slice %82 {offsets = [0, 96], sizes = [8, 32], strides = [1, 1]} : vector<8x128xf32> to vector<8x32xf32>
    %87 = vector.extract_strided_slice %83 {offsets = [0, 64], sizes = [8, 32], strides = [1, 1]} : vector<8x128xf32> to vector<8x32xf32>
    %88 = arith.mulf %85, %61 : vector<8x32xf32>
    %89 = arith.mulf %84, %87 : vector<8x32xf32>
    %90 = arith.addf %88, %89 : vector<8x32xf32>
    %91 = math.tanh %90 : vector<8x32xf32>
    %92 = arith.mulf %86, %91 : vector<8x32xf32>
    %93 = arith.truncf %92 : vector<8x32xf32> to vector<8x32xbf16>
    %cst_37 = arith.constant dense<0.000000e+00> : vector<8x16xf32>
    %94 = tpu.matmul %93, %12, %cst_37 {dimension_numbers = #tpu.dot_dimension_numbers<[1], [0], [0], [1], [0, 0, 1, 1], [], []>} : vector<8x32xbf16>, vector<32x16xbf16>, vector<8x16xf32> -> vector<8x16xf32>
    %95 = vector.broadcast %13 : vector<1x16xf32> to vector<8x16xf32>
    %96 = arith.addf %94, %95 : vector<8x16xf32>
    %97 = arith.negf %96 : vector<8x16xf32>
    %98 = math.exp %97 : vector<8x16xf32>
    %cst_38 = arith.constant 1.000000e+00 : f32
    %99 = vector.broadcast %cst_38 : f32 to vector<8x16xf32>
    %100 = arith.addf %99, %98 : vector<8x16xf32>
    %101 = arith.divf %99, %100 : vector<8x16xf32>
    %c0_39 = arith.constant 0 : index
    %c32 = arith.constant 32 : index
    %102 = vector.load %arg8[%c0_39, %c32] : memref<8x128xf32, #tpu.memory_space<vmem>>, vector<8x16xf32>
    tpu.vector_store %arg8[%c0_39, %c32], %101 {strides = array<i32>} : memref<8x128xf32, #tpu.memory_space<vmem>>, vector<8x16xf32>,
    %103 = arith.truncf %92 : vector<8x32xf32> to vector<8x32xbf16>
    %cst_40 = arith.constant dense<0.000000e+00> : vector<8x128xf32>
    %104 = tpu.matmul %103, %11, %cst_40 {dimension_numbers = #tpu.dot_dimension_numbers<[1], [0], [0], [1], [0, 0, 1, 1], [], []>} : vector<8x32xbf16>, vector<32x128xbf16>, vector<8x128xf32> -> vector<8x128xf32>
    %c24 = arith.constant 24 : index
    %c0_41 = arith.constant 0 : index
    %105 = vector.load %arg9[%c24, %c0_41] : memref<64x128xf32, #tpu.memory_space<vmem>>, vector<8x128xf32>
    %106 = arith.addf %104, %105 : vector<8x128xf32>
    %107 = arith.negf %106 : vector<8x128xf32>
    %108 = math.exp %107 : vector<8x128xf32>
    %cst_42 = arith.constant 1.000000e+00 : f32
    %109 = vector.broadcast %cst_42 : f32 to vector<8x128xf32>
    %110 = arith.addf %109, %108 : vector<8x128xf32>
    %111 = arith.divf %109, %110 : vector<8x128xf32>
    %112 = math.tanh %106 : vector<8x128xf32>
    %113 = vector.extract_strided_slice %111 {offsets = [0, 0], sizes = [8, 32], strides = [1, 1]} : vector<8x128xf32> to vector<8x32xf32>
    %114 = vector.extract_strided_slice %111 {offsets = [0, 32], sizes = [8, 32], strides = [1, 1]} : vector<8x128xf32> to vector<8x32xf32>
    %115 = vector.extract_strided_slice %111 {offsets = [0, 96], sizes = [8, 32], strides = [1, 1]} : vector<8x128xf32> to vector<8x32xf32>
    %116 = vector.extract_strided_slice %112 {offsets = [0, 64], sizes = [8, 32], strides = [1, 1]} : vector<8x128xf32> to vector<8x32xf32>
    %117 = arith.mulf %114, %90 : vector<8x32xf32>
    %118 = arith.mulf %113, %116 : vector<8x32xf32>
    %119 = arith.addf %117, %118 : vector<8x32xf32>
    %120 = math.tanh %119 : vector<8x32xf32>
    %121 = arith.mulf %115, %120 : vector<8x32xf32>
    %122 = arith.truncf %121 : vector<8x32xf32> to vector<8x32xbf16>
    %cst_43 = arith.constant dense<0.000000e+00> : vector<8x16xf32>
    %123 = tpu.matmul %122, %12, %cst_43 {dimension_numbers = #tpu.dot_dimension_numbers<[1], [0], [0], [1], [0, 0, 1, 1], [], []>} : vector<8x32xbf16>, vector<32x16xbf16>, vector<8x16xf32> -> vector<8x16xf32>
    %124 = vector.broadcast %13 : vector<1x16xf32> to vector<8x16xf32>
    %125 = arith.addf %123, %124 : vector<8x16xf32>
    %126 = arith.negf %125 : vector<8x16xf32>
    %127 = math.exp %126 : vector<8x16xf32>
    %cst_44 = arith.constant 1.000000e+00 : f32
    %128 = vector.broadcast %cst_44 : f32 to vector<8x16xf32>
    %129 = arith.addf %128, %127 : vector<8x16xf32>
    %130 = arith.divf %128, %129 : vector<8x16xf32>
    %c0_45 = arith.constant 0 : index
    %c48 = arith.constant 48 : index
    %131 = vector.load %arg8[%c0_45, %c48] : memref<8x128xf32, #tpu.memory_space<vmem>>, vector<8x16xf32>
    tpu.vector_store %arg8[%c0_45, %c48], %130 {strides = array<i32>} : memref<8x128xf32, #tpu.memory_space<vmem>>, vector<8x16xf32>,
    %132 = arith.truncf %121 : vector<8x32xf32> to vector<8x32xbf16>
    %cst_46 = arith.constant dense<0.000000e+00> : vector<8x128xf32>
    %133 = tpu.matmul %132, %11, %cst_46 {dimension_numbers = #tpu.dot_dimension_numbers<[1], [0], [0], [1], [0, 0, 1, 1], [], []>} : vector<8x32xbf16>, vector<32x128xbf16>, vector<8x128xf32> -> vector<8x128xf32>
    %c32_47 = arith.constant 32 : index
    %c0_48 = arith.constant 0 : index
    %134 = vector.load %arg9[%c32_47, %c0_48] : memref<64x128xf32, #tpu.memory_space<vmem>>, vector<8x128xf32>
    %135 = arith.addf %133, %134 : vector<8x128xf32>
    %136 = arith.negf %135 : vector<8x128xf32>
    %137 = math.exp %136 : vector<8x128xf32>
    %cst_49 = arith.constant 1.000000e+00 : f32
    %138 = vector.broadcast %cst_49 : f32 to vector<8x128xf32>
    %139 = arith.addf %138, %137 : vector<8x128xf32>
    %140 = arith.divf %138, %139 : vector<8x128xf32>
    %141 = math.tanh %135 : vector<8x128xf32>
    %142 = vector.extract_strided_slice %140 {offsets = [0, 0], sizes = [8, 32], strides = [1, 1]} : vector<8x128xf32> to vector<8x32xf32>
    %143 = vector.extract_strided_slice %140 {offsets = [0, 32], sizes = [8, 32], strides = [1, 1]} : vector<8x128xf32> to vector<8x32xf32>
    %144 = vector.extract_strided_slice %140 {offsets = [0, 96], sizes = [8, 32], strides = [1, 1]} : vector<8x128xf32> to vector<8x32xf32>
    %145 = vector.extract_strided_slice %141 {offsets = [0, 64], sizes = [8, 32], strides = [1, 1]} : vector<8x128xf32> to vector<8x32xf32>
    %146 = arith.mulf %143, %119 : vector<8x32xf32>
    %147 = arith.mulf %142, %145 : vector<8x32xf32>
    %148 = arith.addf %146, %147 : vector<8x32xf32>
    %149 = math.tanh %148 : vector<8x32xf32>
    %150 = arith.mulf %144, %149 : vector<8x32xf32>
    %151 = arith.truncf %150 : vector<8x32xf32> to vector<8x32xbf16>
    %cst_50 = arith.constant dense<0.000000e+00> : vector<8x16xf32>
    %152 = tpu.matmul %151, %12, %cst_50 {dimension_numbers = #tpu.dot_dimension_numbers<[1], [0], [0], [1], [0, 0, 1, 1], [], []>} : vector<8x32xbf16>, vector<32x16xbf16>, vector<8x16xf32> -> vector<8x16xf32>
    %153 = vector.broadcast %13 : vector<1x16xf32> to vector<8x16xf32>
    %154 = arith.addf %152, %153 : vector<8x16xf32>
    %155 = arith.negf %154 : vector<8x16xf32>
    %156 = math.exp %155 : vector<8x16xf32>
    %cst_51 = arith.constant 1.000000e+00 : f32
    %157 = vector.broadcast %cst_51 : f32 to vector<8x16xf32>
    %158 = arith.addf %157, %156 : vector<8x16xf32>
    %159 = arith.divf %157, %158 : vector<8x16xf32>
    %c0_52 = arith.constant 0 : index
    %c64 = arith.constant 64 : index
    %160 = vector.load %arg8[%c0_52, %c64] : memref<8x128xf32, #tpu.memory_space<vmem>>, vector<8x16xf32>
    tpu.vector_store %arg8[%c0_52, %c64], %159 {strides = array<i32>} : memref<8x128xf32, #tpu.memory_space<vmem>>, vector<8x16xf32>,
    %161 = arith.truncf %150 : vector<8x32xf32> to vector<8x32xbf16>
    %cst_53 = arith.constant dense<0.000000e+00> : vector<8x128xf32>
    %162 = tpu.matmul %161, %11, %cst_53 {dimension_numbers = #tpu.dot_dimension_numbers<[1], [0], [0], [1], [0, 0, 1, 1], [], []>} : vector<8x32xbf16>, vector<32x128xbf16>, vector<8x128xf32> -> vector<8x128xf32>
    %c40 = arith.constant 40 : index
    %c0_54 = arith.constant 0 : index
    %163 = vector.load %arg9[%c40, %c0_54] : memref<64x128xf32, #tpu.memory_space<vmem>>, vector<8x128xf32>
    %164 = arith.addf %162, %163 : vector<8x128xf32>
    %165 = arith.negf %164 : vector<8x128xf32>
    %166 = math.exp %165 : vector<8x128xf32>
    %cst_55 = arith.constant 1.000000e+00 : f32
    %167 = vector.broadcast %cst_55 : f32 to vector<8x128xf32>
    %168 = arith.addf %167, %166 : vector<8x128xf32>
    %169 = arith.divf %167, %168 : vector<8x128xf32>
    %170 = math.tanh %164 : vector<8x128xf32>
    %171 = vector.extract_strided_slice %169 {offsets = [0, 0], sizes = [8, 32], strides = [1, 1]} : vector<8x128xf32> to vector<8x32xf32>
    %172 = vector.extract_strided_slice %169 {offsets = [0, 32], sizes = [8, 32], strides = [1, 1]} : vector<8x128xf32> to vector<8x32xf32>
    %173 = vector.extract_strided_slice %169 {offsets = [0, 96], sizes = [8, 32], strides = [1, 1]} : vector<8x128xf32> to vector<8x32xf32>
    %174 = vector.extract_strided_slice %170 {offsets = [0, 64], sizes = [8, 32], strides = [1, 1]} : vector<8x128xf32> to vector<8x32xf32>
    %175 = arith.mulf %172, %148 : vector<8x32xf32>
    %176 = arith.mulf %171, %174 : vector<8x32xf32>
    %177 = arith.addf %175, %176 : vector<8x32xf32>
    %178 = math.tanh %177 : vector<8x32xf32>
    %179 = arith.mulf %173, %178 : vector<8x32xf32>
    %180 = arith.truncf %179 : vector<8x32xf32> to vector<8x32xbf16>
    %cst_56 = arith.constant dense<0.000000e+00> : vector<8x16xf32>
    %181 = tpu.matmul %180, %12, %cst_56 {dimension_numbers = #tpu.dot_dimension_numbers<[1], [0], [0], [1], [0, 0, 1, 1], [], []>} : vector<8x32xbf16>, vector<32x16xbf16>, vector<8x16xf32> -> vector<8x16xf32>
    %182 = vector.broadcast %13 : vector<1x16xf32> to vector<8x16xf32>
    %183 = arith.addf %181, %182 : vector<8x16xf32>
    %184 = arith.negf %183 : vector<8x16xf32>
    %185 = math.exp %184 : vector<8x16xf32>
    %cst_57 = arith.constant 1.000000e+00 : f32
    %186 = vector.broadcast %cst_57 : f32 to vector<8x16xf32>
    %187 = arith.addf %186, %185 : vector<8x16xf32>
    %188 = arith.divf %186, %187 : vector<8x16xf32>
    %c0_58 = arith.constant 0 : index
    %c80 = arith.constant 80 : index
    %189 = vector.load %arg8[%c0_58, %c80] : memref<8x128xf32, #tpu.memory_space<vmem>>, vector<8x16xf32>
    tpu.vector_store %arg8[%c0_58, %c80], %188 {strides = array<i32>} : memref<8x128xf32, #tpu.memory_space<vmem>>, vector<8x16xf32>,
    %190 = arith.truncf %179 : vector<8x32xf32> to vector<8x32xbf16>
    %cst_59 = arith.constant dense<0.000000e+00> : vector<8x128xf32>
    %191 = tpu.matmul %190, %11, %cst_59 {dimension_numbers = #tpu.dot_dimension_numbers<[1], [0], [0], [1], [0, 0, 1, 1], [], []>} : vector<8x32xbf16>, vector<32x128xbf16>, vector<8x128xf32> -> vector<8x128xf32>
    %c48_60 = arith.constant 48 : index
    %c0_61 = arith.constant 0 : index
    %192 = vector.load %arg9[%c48_60, %c0_61] : memref<64x128xf32, #tpu.memory_space<vmem>>, vector<8x128xf32>
    %193 = arith.addf %191, %192 : vector<8x128xf32>
    %194 = arith.negf %193 : vector<8x128xf32>
    %195 = math.exp %194 : vector<8x128xf32>
    %cst_62 = arith.constant 1.000000e+00 : f32
    %196 = vector.broadcast %cst_62 : f32 to vector<8x128xf32>
    %197 = arith.addf %196, %195 : vector<8x128xf32>
    %198 = arith.divf %196, %197 : vector<8x128xf32>
    %199 = math.tanh %193 : vector<8x128xf32>
    %200 = vector.extract_strided_slice %198 {offsets = [0, 0], sizes = [8, 32], strides = [1, 1]} : vector<8x128xf32> to vector<8x32xf32>
    %201 = vector.extract_strided_slice %198 {offsets = [0, 32], sizes = [8, 32], strides = [1, 1]} : vector<8x128xf32> to vector<8x32xf32>
    %202 = vector.extract_strided_slice %198 {offsets = [0, 96], sizes = [8, 32], strides = [1, 1]} : vector<8x128xf32> to vector<8x32xf32>
    %203 = vector.extract_strided_slice %199 {offsets = [0, 64], sizes = [8, 32], strides = [1, 1]} : vector<8x128xf32> to vector<8x32xf32>
    %204 = arith.mulf %201, %177 : vector<8x32xf32>
    %205 = arith.mulf %200, %203 : vector<8x32xf32>
    %206 = arith.addf %204, %205 : vector<8x32xf32>
    %207 = math.tanh %206 : vector<8x32xf32>
    %208 = arith.mulf %202, %207 : vector<8x32xf32>
    %209 = arith.truncf %208 : vector<8x32xf32> to vector<8x32xbf16>
    %cst_63 = arith.constant dense<0.000000e+00> : vector<8x16xf32>
    %210 = tpu.matmul %209, %12, %cst_63 {dimension_numbers = #tpu.dot_dimension_numbers<[1], [0], [0], [1], [0, 0, 1, 1], [], []>} : vector<8x32xbf16>, vector<32x16xbf16>, vector<8x16xf32> -> vector<8x16xf32>
    %211 = vector.broadcast %13 : vector<1x16xf32> to vector<8x16xf32>
    %212 = arith.addf %210, %211 : vector<8x16xf32>
    %213 = arith.negf %212 : vector<8x16xf32>
    %214 = math.exp %213 : vector<8x16xf32>
    %cst_64 = arith.constant 1.000000e+00 : f32
    %215 = vector.broadcast %cst_64 : f32 to vector<8x16xf32>
    %216 = arith.addf %215, %214 : vector<8x16xf32>
    %217 = arith.divf %215, %216 : vector<8x16xf32>
    %c0_65 = arith.constant 0 : index
    %c96 = arith.constant 96 : index
    %218 = vector.load %arg8[%c0_65, %c96] : memref<8x128xf32, #tpu.memory_space<vmem>>, vector<8x16xf32>
    tpu.vector_store %arg8[%c0_65, %c96], %217 {strides = array<i32>} : memref<8x128xf32, #tpu.memory_space<vmem>>, vector<8x16xf32>,
    %219 = arith.truncf %208 : vector<8x32xf32> to vector<8x32xbf16>
    %cst_66 = arith.constant dense<0.000000e+00> : vector<8x128xf32>
    %220 = tpu.matmul %219, %11, %cst_66 {dimension_numbers = #tpu.dot_dimension_numbers<[1], [0], [0], [1], [0, 0, 1, 1], [], []>} : vector<8x32xbf16>, vector<32x128xbf16>, vector<8x128xf32> -> vector<8x128xf32>
    %c56 = arith.constant 56 : index
    %c0_67 = arith.constant 0 : index
    %221 = vector.load %arg9[%c56, %c0_67] : memref<64x128xf32, #tpu.memory_space<vmem>>, vector<8x128xf32>
    %222 = arith.addf %220, %221 : vector<8x128xf32>
    %223 = arith.negf %222 : vector<8x128xf32>
    %224 = math.exp %223 : vector<8x128xf32>
    %cst_68 = arith.constant 1.000000e+00 : f32
    %225 = vector.broadcast %cst_68 : f32 to vector<8x128xf32>
    %226 = arith.addf %225, %224 : vector<8x128xf32>
    %227 = arith.divf %225, %226 : vector<8x128xf32>
    %228 = math.tanh %222 : vector<8x128xf32>
    %229 = vector.extract_strided_slice %227 {offsets = [0, 0], sizes = [8, 32], strides = [1, 1]} : vector<8x128xf32> to vector<8x32xf32>
    %230 = vector.extract_strided_slice %227 {offsets = [0, 32], sizes = [8, 32], strides = [1, 1]} : vector<8x128xf32> to vector<8x32xf32>
    %231 = vector.extract_strided_slice %227 {offsets = [0, 96], sizes = [8, 32], strides = [1, 1]} : vector<8x128xf32> to vector<8x32xf32>
    %232 = vector.extract_strided_slice %228 {offsets = [0, 64], sizes = [8, 32], strides = [1, 1]} : vector<8x128xf32> to vector<8x32xf32>
    %233 = arith.mulf %230, %206 : vector<8x32xf32>
    %234 = arith.mulf %229, %232 : vector<8x32xf32>
    %235 = arith.addf %233, %234 : vector<8x32xf32>
    %236 = math.tanh %235 : vector<8x32xf32>
    %237 = arith.mulf %231, %236 : vector<8x32xf32>
    %238 = arith.truncf %237 : vector<8x32xf32> to vector<8x32xbf16>
    %cst_69 = arith.constant dense<0.000000e+00> : vector<8x16xf32>
    %239 = tpu.matmul %238, %12, %cst_69 {dimension_numbers = #tpu.dot_dimension_numbers<[1], [0], [0], [1], [0, 0, 1, 1], [], []>} : vector<8x32xbf16>, vector<32x16xbf16>, vector<8x16xf32> -> vector<8x16xf32>
    %240 = vector.broadcast %13 : vector<1x16xf32> to vector<8x16xf32>
    %241 = arith.addf %239, %240 : vector<8x16xf32>
    %242 = arith.negf %241 : vector<8x16xf32>
    %243 = math.exp %242 : vector<8x16xf32>
    %cst_70 = arith.constant 1.000000e+00 : f32
    %244 = vector.broadcast %cst_70 : f32 to vector<8x16xf32>
    %245 = arith.addf %244, %243 : vector<8x16xf32>
    %246 = arith.divf %244, %245 : vector<8x16xf32>
    %c0_71 = arith.constant 0 : index
    %c112 = arith.constant 112 : index
    %247 = vector.load %arg8[%c0_71, %c112] : memref<8x128xf32, #tpu.memory_space<vmem>>, vector<8x16xf32>
    tpu.vector_store %arg8[%c0_71, %c112], %246 {strides = array<i32>} : memref<8x128xf32, #tpu.memory_space<vmem>>, vector<8x16xf32>,
    %c0_72 = arith.constant 0 : index
    %c0_73 = arith.constant 0 : index
    %248 = vector.load %arg10[%c0_72, %c0_73] : memref<8x32xf32, #tpu.memory_space<vmem>>, vector<8x32xf32>
    tpu.vector_store %arg10[%c0_72, %c0_73], %237 {strides = array<i32>} : memref<8x32xf32, #tpu.memory_space<vmem>>, vector<8x32xf32>,
    %c0_74 = arith.constant 0 : index
    %c0_75 = arith.constant 0 : index
    %249 = vector.load %arg11[%c0_74, %c0_75] : memref<8x32xf32, #tpu.memory_space<vmem>>, vector<8x32xf32>
    tpu.vector_store %arg11[%c0_74, %c0_75], %235 {strides = array<i32>} : memref<8x32xf32, #tpu.memory_space<vmem>>, vector<8x32xf32>,
    return
  }
  func.func @transform_0(%arg0: i32, %arg1: i32) -> (i32, i32, i32) {
    %c0_i32 = arith.constant 0 : i32
    %c0_i32_0 = arith.constant 0 : i32
    return %arg1, %arg0, %c0_i32 : i32, i32, i32
  }
  func.func @transform_1(%arg0: i32, %arg1: i32) -> (i32, i32) {
    %c0_i32 = arith.constant 0 : i32
    %c0_i32_0 = arith.constant 0 : i32
    %c0_i32_1 = arith.constant 0 : i32
    return %c0_i32, %c0_i32_0 : i32, i32
  }
  func.func @transform_2(%arg0: i32, %arg1: i32) -> (i32, i32) {
    %c0_i32 = arith.constant 0 : i32
    %c0_i32_0 = arith.constant 0 : i32
    %c0_i32_1 = arith.constant 0 : i32
    return %c0_i32, %c0_i32_0 : i32, i32
  }
  func.func @transform_3(%arg0: i32, %arg1: i32) -> (i32, i32) {
    %c0_i32 = arith.constant 0 : i32
    %c0_i32_0 = arith.constant 0 : i32
    %c0_i32_1 = arith.constant 0 : i32
    return %c0_i32, %c0_i32_0 : i32, i32
  }
  func.func @transform_4(%arg0: i32, %arg1: i32) -> (i32, i32) {
    %c0_i32 = arith.constant 0 : i32
    %c0_i32_0 = arith.constant 0 : i32
    %c0_i32_1 = arith.constant 0 : i32
    return %c0_i32, %c0_i32_0 : i32, i32
  }
  func.func @transform_5(%arg0: i32, %arg1: i32) -> (i32, i32) {
    %c0_i32 = arith.constant 0 : i32
    %c0_i32_0 = arith.constant 0 : i32
    %c0_i32_1 = arith.constant 0 : i32
    return %c0_i32, %c0_i32_0 : i32, i32
  }
  func.func @transform_6(%arg0: i32, %arg1: i32) -> (i32, i32) {
    %c0_i32 = arith.constant 0 : i32
    return %arg0, %arg1 : i32, i32
  }
}

</mosaic_0001>

<bundles_post_ra>
// kernel: tpu_custom_call.1
= control target key start
LH: loop header
LB: loop body
LE: loop exit
PB: predicated region body
PF: predicated region fallthrough
CT: control target
= control target key end

     0   :  { %11 = vsyncpa [#allocation6], 0  ;;  %s2028_s0 = inlined_call_operand.hbm [shape: bf16[8,8,32], index: 0, kind: input, shape index: {}]   ;;  %s2029_s1 = inlined_call_operand.vmem [shape: bf16[32,128], index: 1, kind: input, shape index: {}]   ;;  %s2030_s2 = inlined_call_operand.hbm [shape: bf16[32,128], index: 2, kind: input, shape index: {}]   ;;  %s2031_s3 = inlined_call_operand.vmem [shape: f32[1,128], index: 3, kind: input, shape index: {}]   ;;  %s2032_s4 = inlined_call_operand.vmem [shape: bf16[32,16], index: 4, kind: input, shape index: {}]   ;;  %s2033_s5 = inlined_call_operand.vmem [shape: f32[1,16], index: 5, kind: input, shape index: {}]   ;;  %s2034_s6 = inlined_call_operand.hbm [shape: f32[8,128], index: 6, kind: output, shape index: {}]  }
   0x1   :  { %12 = vsyncpa [#allocation9], 0 }
   0x2   :  { %13 = vsyncpa [#allocation7], 0  ;;  %s1693_s21 = smov [#allocation5]   ;;  %s1621_s25 = scalar_lea.hbm %s2028_s0, 512 }
   0x3   :  { %s19_s22 = sshll.u32 %s1693_s21, 4  ;;  %p1622_p0 = scmp.ne.s32.totalorder %s2028_s0, %s1621_s25  ;;  %s20_s22 = int_to_ptr.vmem [resolvable:$true] %s19_s22 }
   0x4   :  { %p1625_p1 = scmp.lt.u32.totalorder %s1621_s25, %s2028_s0 }
   0x6   :  { %p1627_p2 = pnand %p1625_p1, %p1622_p0 }
   0x8   :  { %1630 = shalt.err (!%p1627_p2)
}
   0x9   :  { %s1631_s30 = scalar_lea.vmem %s20_s22, 512  ;;  %p1636_p4 = scmp.lt.s32.totalorder %s20_s22, %s20_s22 }
   0xa   :  { %p1632_p3 = scmp.ne.s32.totalorder %s20_s22, %s1631_s30  ;;  %p1637_p5 = scmp.lt.s32.totalorder %s1631_s30, %s1631_s30 }
   0xc   :  { %p1638_p6 = por %p1637_p5, %p1636_p4 }
   0xe   :  { %p1639_p7 = pnand %p1638_p6, %p1632_p3 }
  0x10   :  { %1642 = shalt.err (!%p1639_p7)
}
  0x11   :  { %s1694_s7 = smov 64   ;;  %s1695_s8 = smov 4  }
  0x12   :  { %25 = dma.hbm_to_vmem [thread:$0]  %s2028_s0, 512, %s20_s22, [#allocation6], %s1694_s7, %s1694_s7, %s1695_s8  }
  0x13   :  { %s1696_s11 = smov [#allocation8]   ;;  %s1643_s15 = scalar_lea.hbm %s2030_s2, 256 }
  0x14   :  { %s33_s12 = sshll.u32 %s1696_s11, 4  ;;  %p1644_p8 = scmp.ne.s32.totalorder %s2030_s2, %s1643_s15  ;;  %s34_s12 = int_to_ptr.vmem [resolvable:$true] %s33_s12 }
  0x15   :  { %p1647_p9 = scmp.lt.u32.totalorder %s1643_s15, %s2030_s2 }
  0x17   :  { %p1649_p10 = pnand %p1647_p9, %p1644_p8 }
  0x19   :  { %1652 = shalt.err (!%p1649_p10)
}
  0x1a   :  { %s1653_s20 = scalar_lea.vmem %s34_s12, 256  ;;  %p1658_p12 = scmp.lt.s32.totalorder %s34_s12, %s34_s12 }
  0x1b   :  { %p1654_p11 = scmp.ne.s32.totalorder %s34_s12, %s1653_s20  ;;  %p1659_p13 = scmp.lt.s32.totalorder %s1653_s20, %s1653_s20 }
  0x1d   :  { %p1660_p0 = por %p1659_p13, %p1658_p12 }
  0x1f   :  { %p1661_p1 = pnand %p1660_p0, %p1654_p11 }
  0x21   :  { %1664 = shalt.err (!%p1661_p1)
}
  0x22   :  { %39 = dma.hbm_to_vmem [thread:$0]  %s2030_s2, 256, %s34_s12, [#allocation9], %s1694_s7, %s1694_s7, %s1695_s8  }
  0x23   :  { %1687 = dma.done.wait [#allocation6], 512  }
  0x24   :  { %1688 = vsyncadd [#allocation6], 4294966784 }
  0x25   :  { %1689 = dma.done.wait [#allocation9], 256  }
  0x26   :  { %1690 = vsyncadd [#allocation9], 4294967040  ;;  %vm57_vm0 = vcmask 261120   ;;  %v1697_v0 = vmov 0.0   ;;  %vm1698_vm1 = vmmov 0   ;;  %v1515_v1 = vld [vmem:[%s2029_s1] sm:$0xff]  }
  0x27   :  { %1374 = vmatprep.subr.bf16.mxu1 %v1697_v0  ;;  %58 = vst.msk [vmem:[#allocation3] sm:$0xff] %vm57_vm0, %v1697_v0  ;;  %59 = vst.msk [vmem:[#allocation4] sm:$0xff] %vm57_vm0, %v1697_v0  ;;  %1378 = vmatprep.mubr.msk.bf16.mxu1 %vm1698_vm1, %v1697_v0  ;;  %v1779_v2 = vld [vmem:[#allocation8] sm:$0xff]   ;;  %v1517_v3 = vld [vmem:[%s2029_s1 + $0x8] sm:$0xff]   ;;  %vm364_vm2 = vcmask 130048   ;;  %s1701_s8 = smov 48  }
  0x28   :  { %1362 = vmatprep.subr.bf16.mxu0 %v1515_v1  ;;  %1375 = vmatpush3.bf16.msra.mxu1 %v1779_v2  ;;  %v1785_v4 = vld [vmem:[#allocation8 + $0x8] sm:$0xff]   ;;  %v1519_v5 = vld [vmem:[#allocation5] sm:$0xff]   ;;  %v1803_v9 = vld [vmem:[%s2031_s3] ss:$0 sm:$0xff]  ;;  %s1699_s3 = smov 32   ;;  %s1702_s9 = smov 80  }
  0x29   :  { %1363 = vmatpush3.bf16.msra.mxu0 %v1515_v1  ;;  %1376 = vmatprep.subr.bf16.mxu1 %v1697_v0  ;;  %v1520_v6 = vld [vmem:[#allocation5 + $0x8] sm:$0xff]   ;;  %v1521_v32 = vld [vmem:[#allocation5 + $0x10] sm:$0xff]   ;;  %v1522_v33 = vld [vmem:[#allocation5 + $0x18] sm:$0xff]   ;;  %vm488_vm3 = vcmask 261248   ;;  %s1703_s10 = smov 96   ;;  %vm612_vm4 = vcmask 392448  }
  0x2a   :  { %1364 = vmatprep.subr.bf16.mxu0 %v1517_v3  ;;  %1366 = vmatprep.mubr.msk.bf16.mxu0 %vm57_vm0, %v1519_v5  ;;  %v1819_v34 = vld [vmem:[%s2032_s4] sm:$0xff]   ;;  %v1826_v35 = vld [vmem:[%s2032_s4 + $0x8] sm:$0xff]   ;;  %vm736_vm5 = vcmask 523648   ;;  %vm860_vm6 = vcmask 654848   ;;  %vm984_vm7 = vcmask 786048   ;;  %vm1108_vm8 = vcmask 917248  }
  0x2b   :  { %v1861_v45 = vld [vmem:[%s2033_s5] ss:$0 sm:$0xff]  ;;  %s1700_s5 = smov 16   ;;  %s1705_s11 = smov [#allocation10]   ;;  %vm1232_vm9 = vcmask 1048448  }
  0x2c   :  { %1377 = vmatpush3.bf16.msra.mxu1 %v1785_v4  ;;  %s1250_s12 = sshll.u32 %s1705_s11, 4  ;;  %s1251_s12 = int_to_ptr.vmem [resolvable:$true] %s1250_s12 }
  0x2d   :  { %1365 = vmatpush3.bf16.msra.mxu0 %v1517_v3  ;;  %1382 = vmatprep.subr.bf16.mxu1 %v1697_v0  ;;  %s1665_s13 = scalar_lea.vmem %s1251_s12, 128  ;;  %p1670_p3 = scmp.lt.s32.totalorder %s1251_s12, %s1251_s12 }
  0x2e   :  { %v206_v7 = vld [vmem:[#allocation3] sm:$0xff]  ;;  %1390 = vmatprep.subr.bf16.mxu0 %v1697_v0  ;;  %v207_v21 = vld [vmem:[#allocation4] sm:$0xff]  ;;  %p1666_p2 = scmp.ne.s32.totalorder %s1251_s12, %s1665_s13  ;;  %p1671_p4 = scmp.lt.s32.totalorder %s1665_s13, %s1665_s13 }
  0x2f   :  { %v208_v8 = vpack.c.bf16 %v206_v7, %v206_v7 }
  0x30   :  { %1367 = vmatmul.mubr.msk.bf16.vlgmr.msra.gmra.mrb[0].mxu0 %vm57_vm0, %v1520_v6  ;;  %p1672_p5 = por %p1671_p4, %p1670_p3 }
  0x31   :  { %1379 = vmatmul.mubr.msk.bf16.vlgmr.msra.gmra.mrb[0].mxu1 %vm57_vm0, %v208_v8  ;;  %1391 = vmatpush3.bf16.msra.mxu0 %v1779_v2 }
  0x32   :  { %1386 = vmatprep.mubr.msk.bf16.mxu1 %vm1698_vm1, %v1697_v0  ;;  %1392 = vmatprep.subr.bf16.mxu0 %v1697_v0  ;;  %p1673_p6 = pnand %p1672_p5, %p1666_p2 }
  0x33   :  { %1370 = vmatprep.mubr.msk.bf16.mxu0 %vm57_vm0, %v1521_v32  ;;  %1383 = vmatpush3.bf16.msra.mxu1 %v1819_v34 }
  0x34   :  { %1384 = vmatprep.subr.bf16.mxu1 %v1697_v0 }
  0x35   :  { %1393 = vmatpush3.bf16.msra.mxu0 %v1785_v4 }
  0x36   :  { %1406 = vmatprep.subr.bf16.mxu0 %v1697_v0 }
  0x37   :  { %1385 = vmatpush3.bf16.msra.mxu1 %v1826_v35 }
  0x38   :  { %1371 = vmatmul.mubr.msk.bf16.gmra.mrb[4].mxu0 %vm57_vm0, %v1522_v33  ;;  %1398 = vmatprep.subr.bf16.mxu1 %v1697_v0 }
  0x39   :  { %1394 = vmatprep.mubr.msk.bf16.mxu0 %vm1698_vm1, %v1697_v0 }
 0x103   :  { %v1805_v10 = vpop.f32.mrb[0].mxu0 }
 0x104   :  { %v259_v11 = vpop.f32.mrb[0].mxu1  ;;  %v158_v12 = vpop.f32.mrb[1].mxu0 }
 0x105   :  { %v1380_v13 = vpop.f32.mrb[1].mxu1  ;;  %v159_v14 = vadd.f32 %v1803_v9, %v158_v12  ;;  %v1808_v15 = vpop.f32.mrb[2].mxu0 }
 0x106   :  { %v262_v16 = vpop.f32.mrb[2].mxu1  ;;  %v161_v17 = vpop.f32.mrb[3].mxu0 }
 0x107   :  { %v1381_v18 = vpop.f32.mrb[3].mxu1  ;;  %v260_v19 = vadd.f32 %v259_v11, %v159_v14  ;;  %v162_v46 = vadd.f32 %v1803_v9, %v161_v17 }
 0x108   :  { %v167_v18 = vadd.f32 %v1805_v10, %v1803_v9 }
 0x109   :  { %1525 = vtanh.f32 %v260_v19  ;;  %v1274_v22 = vmul.f32 -1.442695, %v260_v19 }
 0x10b   :  { %1527 = vpow2.f32 %v1274_v22  ;;  %v1836_v40 = vpop.f32.mrb[4].mxu0 }
 0x10c   :  { %v1838_v41 = vpop.f32.mrb[5].mxu0 }
 0x10d   :  { %v1840_v42 = vpop.f32.mrb[6].mxu0 }
 0x10e   :  { %v1842_v43 = vpop.f32.mrb[7].mxu0 }
 0x113   :  { %v1526_v20 = vpop.eup %1525 }
 0x114   :  { %278 = vrot.lane.b32.xlu0 %v1526_v20, %s1694_s7 }
 0x115   :  { %v1528_v23 = vpop.eup %1527 }
 0x116   :  { %v268_v24 = vadd.f32 1.0, %v1528_v23 }
 0x118   :  { %273 = vrot.lane.b32.xlu0 %v207_v21, %s1699_s3  ;;  %1529 = vrcp.f32 %v268_v24 }
 0x122   :  { %v1530_v25 = vpop.eup %1529 }
 0x186   :  { %v279_v26 = vpop.permute.xlu0 %278 }
 0x187   :  { %v281_v27 = vmul.f32 %v1530_v25, %v279_v26 }
 0x189   :  { %283 = vrot.lane.b32.xlu1 %v281_v27, %s1699_s3 }
 0x18a   :  { %v274_v28 = vpop.permute.xlu0 %273 }
 0x18b   :  { %v276_v29 = vmul.f32 %v1530_v25, %v274_v28 }
 0x1fb   :  { %v284_v30 = vpop.permute.xlu1 %283 }
 0x1fc   :  { %v1813_v31 = vadd.f32 %v284_v30, %v276_v29 }
 0x1fe   :  { %1531 = vtanh.f32 %v1813_v31 }
 0x208   :  { %v1532_v36 = vpop.eup %1531 }
 0x209   :  { %289 = vrot.lane.b32.xlu1 %v1532_v36, %s1694_s7 }
 0x27b   :  { %v290_v37 = vpop.permute.xlu1 %289 }
 0x27c   :  { %v292_v38 = vmul.f32 %v1530_v25, %v290_v37 }
 0x27e   :  { %v293_v39 = vpack.c.bf16 %v292_v38, %v292_v38 }
 0x280   :  { %301 = vrot.lane.b32.xlu0 %v293_v39, %s1699_s3 }
 0x2f2   :  { %v302_v44 = vpop.permute.xlu0 %301 }
 0x2f3   :  { %1387 = vmatmul.mubr.msk.bf16.vlgmr.msra.gmra.mrb[4].mxu1 %vm57_vm0, %v302_v44  ;;  %1395 = vmatmul.mubr.msk.bf16.vlgmr.msra.gmra.mrb[8].mxu0 %vm57_vm0, %v302_v44 }
 0x2f4   :  { %1407 = vmatpush3.bf16.msra.mxu0 %v1779_v2  ;;  %1399 = vmatpush3.bf16.msra.mxu1 %v1819_v34 }
 0x2f5   :  { %1408 = vmatprep.subr.bf16.mxu0 %v1697_v0  ;;  %1400 = vmatprep.subr.bf16.mxu1 %v1697_v0 }
 0x2f6   :  { %1410 = vmatprep.mubr.msk.bf16.mxu0 %vm1698_vm1, %v1697_v0  ;;  %1402 = vmatprep.mubr.msk.bf16.mxu1 %vm1698_vm1, %v1697_v0 }
 0x2f8   :  { %1409 = vmatpush3.bf16.msra.mxu0 %v1785_v4  ;;  %1401 = vmatpush3.bf16.msra.mxu1 %v1826_v35 }
 0x2f9   :  { %1422 = vmatprep.subr.bf16.mxu0 %v1697_v0  ;;  %1414 = vmatprep.subr.bf16.mxu1 %v1697_v0 }
 0x3c6   :  { %v352_v47 = vpop.f32.mrb[4].mxu1  ;;  %v401_v48 = vpop.f32.mrb[8].mxu0 }
 0x3c7   :  { %v353_v49 = vadd.f32 %v1861_v45, %v352_v47  ;;  %v402_v50 = vadd.f32 %v401_v48, %v162_v46  ;;  %v1388_v51 = vpop.f32.mrb[5].mxu1  ;;  %v1396_v52 = vpop.f32.mrb[9].mxu0 }
 0x3c8   :  { %v355_v53 = vpop.f32.mrb[6].mxu1  ;;  %v404_v54 = vpop.f32.mrb[10].mxu0 }
 0x3c9   :  { %v1279_v55 = vmul.f32 -1.442695, %v353_v49  ;;  %1533 = vtanh.f32 %v402_v50  ;;  %v1389_v56 = vpop.f32.mrb[7].mxu1  ;;  %v1397_v57 = vpop.f32.mrb[11].mxu0  ;;  %v1281_v62 = vmul.f32 -1.442695, %v402_v50  ;;  %v170_v49 = vadd.f32 %v1808_v15, %v1803_v9 }
 0x3cb   :  { %1535 = vpow2.f32 %v1279_v55 }
 0x3d3   :  { %v1534_v58 = vpop.eup %1533 }
 0x3d4   :  { %416 = vrot.lane.b32.xlu1 %v1534_v58, %s1694_s7 }
 0x3d5   :  { %v1536_v59 = vpop.eup %1535 }
 0x3d6   :  { %v361_v60 = vadd.f32 1.0, %v1536_v59 }
 0x3d8   :  { %1537 = vrcp.f32 %v361_v60 }
 0x3d9   :  { %1539 = vpow2.f32 %v1281_v62 }
 0x3e2   :  { %v1538_v61 = vpop.eup %1537 }
 0x3e3   :  { %365 = vst.msk [vmem:[#allocation10] sm:$0xff] %vm364_vm2, %v1538_v61  ;;  %v1540_v63 = vpop.eup %1539 }
 0x3e4   :  { %v410_v1 = vadd.f32 1.0, %v1540_v63 }
 0x3e6   :  { %1541 = vrcp.f32 %v410_v1 }
 0x3f0   :  { %v1542_v3 = vpop.eup %1541 }
 0x3f1   :  { %v414_v7 = vmul.f32 %v1542_v3, %v1813_v31 }
 0x446   :  { %v417_v5 = vpop.permute.xlu1 %416 }
 0x447   :  { %v419_v6 = vmul.f32 %v1542_v3, %v417_v5 }
 0x449   :  { %421 = vrot.lane.b32.xlu0 %v419_v6, %s1699_s3 }
 0x4bb   :  { %v422_v8 = vpop.permute.xlu0 %421 }
 0x4bc   :  { %v424_v11 = vadd.f32 %v422_v8, %v414_v7 }
 0x4be   :  { %1543 = vtanh.f32 %v424_v11 }
 0x4c8   :  { %v1544_v12 = vpop.eup %1543 }
 0x4c9   :  { %427 = vrot.lane.b32.xlu1 %v1544_v12, %s1694_s7 }
 0x53b   :  { %v428_v13 = vpop.permute.xlu1 %427 }
 0x53c   :  { %v430_v14 = vmul.f32 %v1542_v3, %v428_v13 }
 0x53e   :  { %v431_v16 = vpack.c.bf16 %v430_v14, %v430_v14  ;;  %v175_v14 = vadd.f32 %v1803_v9, %v1838_v41 }
 0x540   :  { %433 = vrot.lane.b32.xlu0 %v431_v16, %s1699_s3 }
 0x5b2   :  { %v434_v17 = vpop.permute.xlu0 %433 }
 0x5b3   :  { %1403 = vmatmul.mubr.msk.bf16.vlgmr.msra.gmra.mrb[8].mxu1 %vm57_vm0, %v434_v17  ;;  %1411 = vmatmul.mubr.msk.bf16.vlgmr.msra.gmra.mrb[12].mxu0 %vm57_vm0, %v434_v17 }
 0x5b4   :  { %1423 = vmatpush3.bf16.msra.mxu0 %v1779_v2  ;;  %1415 = vmatpush3.bf16.msra.mxu1 %v1819_v34 }
 0x5b5   :  { %1424 = vmatprep.subr.bf16.mxu0 %v1697_v0  ;;  %1416 = vmatprep.subr.bf16.mxu1 %v1697_v0 }
 0x5b6   :  { %1426 = vmatprep.mubr.msk.bf16.mxu0 %vm1698_vm1, %v1697_v0  ;;  %1418 = vmatprep.mubr.msk.bf16.mxu1 %vm1698_vm1, %v1697_v0 }
 0x5b8   :  { %1425 = vmatpush3.bf16.msra.mxu0 %v1785_v4  ;;  %1417 = vmatpush3.bf16.msra.mxu1 %v1826_v35 }
 0x5b9   :  { %1438 = vmatprep.subr.bf16.mxu0 %v1697_v0  ;;  %1430 = vmatprep.subr.bf16.mxu1 %v1697_v0 }
 0x686   :  { %v1886_v19 = vpop.f32.mrb[8].mxu1  ;;  %v525_v20 = vpop.f32.mrb[12].mxu0 }
 0x687   :  { %v526_v21 = vadd.f32 %v525_v20, %v167_v18  ;;  %v1404_v22 = vpop.f32.mrb[9].mxu1  ;;  %v1412_v23 = vpop.f32.mrb[13].mxu0 }
 0x688   :  { %v475_v24 = vpop.f32.mrb[10].mxu1  ;;  %v528_v25 = vpop.f32.mrb[14].mxu0 }
 0x689   :  { %1545 = vtanh.f32 %v526_v21  ;;  %v1405_v26 = vpop.f32.mrb[11].mxu1  ;;  %v1413_v27 = vpop.f32.mrb[15].mxu0  ;;  %v1285_v29 = vmul.f32 -1.442695, %v526_v21 }
 0x68b   :  { %1547 = vpow2.f32 %v1285_v29 }
 0x693   :  { %v1546_v28 = vpop.eup %1545 }
 0x694   :  { %540 = vrot.lane.b32.xlu1 %v1546_v28, %s1694_s7 }
 0x695   :  { %v1548_v30 = vpop.eup %1547 }
 0x696   :  { %v534_v31 = vadd.f32 1.0, %v1548_v30 }
 0x698   :  { %1549 = vrcp.f32 %v534_v31 }
 0x6a2   :  { %v1550_v10 = vpop.eup %1549 }
 0x6a3   :  { %v538_v36 = vmul.f32 %v1550_v10, %v424_v11 }
 0x706   :  { %v541_v32 = vpop.permute.xlu1 %540 }
 0x707   :  { %v543_v33 = vmul.f32 %v1550_v10, %v541_v32 }
 0x709   :  { %545 = vrot.lane.b32.xlu0 %v543_v33, %s1699_s3 }
 0x77b   :  { %v546_v37 = vpop.permute.xlu0 %545 }
 0x77c   :  { %v548_v38 = vadd.f32 %v546_v37, %v538_v36 }
 0x77e   :  { %1551 = vtanh.f32 %v548_v38 }
 0x788   :  { %v1552_v39 = vpop.eup %1551 }
 0x789   :  { %551 = vrot.lane.b32.xlu1 %v1552_v39, %s1694_s7 }
 0x7fb   :  { %v552_v44 = vpop.permute.xlu1 %551 }
 0x7fc   :  { %v554_v46 = vmul.f32 %v1550_v10, %v552_v44 }
 0x7fe   :  { %v555_v47 = vpack.c.bf16 %v554_v46, %v554_v46  ;;  %v178_v46 = vadd.f32 %v1803_v9, %v1842_v43 }
 0x800   :  { %557 = vrot.lane.b32.xlu0 %v555_v47, %s1699_s3 }
 0x872   :  { %v558_v48 = vpop.permute.xlu0 %557 }
 0x873   :  { %1419 = vmatmul.mubr.msk.bf16.vlgmr.msra.gmra.mrb[12].mxu1 %vm57_vm0, %v558_v48  ;;  %1427 = vmatmul.mubr.msk.bf16.vlgmr.msra.gmra.mrb[16].mxu0 %vm57_vm0, %v558_v48 }
 0x874   :  { %1439 = vmatpush3.bf16.msra.mxu0 %v1779_v2  ;;  %1431 = vmatpush3.bf16.msra.mxu1 %v1819_v34 }
 0x875   :  { %1440 = vmatprep.subr.bf16.mxu0 %v1697_v0  ;;  %1432 = vmatprep.subr.bf16.mxu1 %v1697_v0 }
 0x876   :  { %1442 = vmatprep.mubr.msk.bf16.mxu0 %vm1698_vm1, %v1697_v0  ;;  %1434 = vmatprep.mubr.msk.bf16.mxu1 %vm1698_vm1, %v1697_v0 }
 0x878   :  { %1441 = vmatpush3.bf16.msra.mxu0 %v1785_v4  ;;  %1433 = vmatpush3.bf16.msra.mxu1 %v1826_v35 }
 0x879   :  { %1454 = vmatprep.subr.bf16.mxu0 %v1697_v0  ;;  %1446 = vmatprep.subr.bf16.mxu1 %v1697_v0 }
 0x946   :  { %v1908_v50 = vpop.f32.mrb[12].mxu1  ;;  %v649_v51 = vpop.f32.mrb[16].mxu0 }
 0x947   :  { %v650_v52 = vadd.f32 %v649_v51, %v170_v49  ;;  %v1420_v53 = vpop.f32.mrb[13].mxu1  ;;  %v1428_v54 = vpop.f32.mrb[17].mxu0 }
 0x948   :  { %v599_v55 = vpop.f32.mrb[14].mxu1  ;;  %v652_v56 = vpop.f32.mrb[18].mxu0 }
 0x949   :  { %1553 = vtanh.f32 %v650_v52  ;;  %v1421_v57 = vpop.f32.mrb[15].mxu1  ;;  %v1429_v58 = vpop.f32.mrb[19].mxu0  ;;  %v1289_v60 = vmul.f32 -1.442695, %v650_v52 }
 0x94b   :  { %1555 = vpow2.f32 %v1289_v60 }
 0x953   :  { %v1554_v59 = vpop.eup %1553 }
 0x954   :  { %664 = vrot.lane.b32.xlu1 %v1554_v59, %s1694_s7 }
 0x955   :  { %v1556_v61 = vpop.eup %1555 }
 0x956   :  { %v658_v62 = vadd.f32 1.0, %v1556_v61 }
 0x958   :  { %1557 = vrcp.f32 %v658_v62 }
 0x962   :  { %v1558_v15 = vpop.eup %1557 }
 0x963   :  { %v662_v3 = vmul.f32 %v1558_v15, %v548_v38 }
 0x9c6   :  { %v665_v63 = vpop.permute.xlu1 %664 }
 0x9c7   :  { %v667_v1 = vmul.f32 %v1558_v15, %v665_v63 }
 0x9c9   :  { %669 = vrot.lane.b32.xlu0 %v667_v1, %s1699_s3 }
 0xa3b   :  { %v670_v5 = vpop.permute.xlu0 %669 }
 0xa3c   :  { %v672_v6 = vadd.f32 %v670_v5, %v662_v3 }
 0xa3e   :  { %1559 = vtanh.f32 %v672_v6 }
 0xa48   :  { %v1560_v7 = vpop.eup %1559 }
 0xa49   :  { %675 = vrot.lane.b32.xlu1 %v1560_v7, %s1694_s7 }
 0xabb   :  { %v676_v8 = vpop.permute.xlu1 %675 }
 0xabc   :  { %v678_v11 = vmul.f32 %v1558_v15, %v676_v8 }
 0xabe   :  { %v679_v12 = vpack.c.bf16 %v678_v11, %v678_v11 }
 0xac0   :  { %681 = vrot.lane.b32.xlu0 %v679_v12, %s1699_s3 }
 0xb32   :  { %v682_v13 = vpop.permute.xlu0 %681 }
 0xb33   :  { %1435 = vmatmul.mubr.msk.bf16.vlgmr.msra.gmra.mrb[16].mxu1 %vm57_vm0, %v682_v13  ;;  %1443 = vmatmul.mubr.msk.bf16.vlgmr.msra.gmra.mrb[20].mxu0 %vm57_vm0, %v682_v13 }
 0xb34   :  { %1455 = vmatpush3.bf16.msra.mxu0 %v1779_v2  ;;  %1447 = vmatpush3.bf16.msra.mxu1 %v1819_v34 }
 0xb35   :  { %1456 = vmatprep.subr.bf16.mxu0 %v1697_v0  ;;  %1448 = vmatprep.subr.bf16.mxu1 %v1697_v0 }
 0xb36   :  { %1458 = vmatprep.mubr.msk.bf16.mxu0 %vm1698_vm1, %v1697_v0  ;;  %1450 = vmatprep.mubr.msk.bf16.mxu1 %vm1698_vm1, %v1697_v0 }
 0xb38   :  { %1457 = vmatpush3.bf16.msra.mxu0 %v1785_v4  ;;  %1449 = vmatpush3.bf16.msra.mxu1 %v1826_v35 }
 0xb39   :  { %1470 = vmatprep.subr.bf16.mxu0 %v1697_v0  ;;  %1462 = vmatprep.subr.bf16.mxu1 %v1697_v0 }
 0xc06   :  { %v1930_v16 = vpop.f32.mrb[16].mxu1  ;;  %v773_v17 = vpop.f32.mrb[20].mxu0 }
 0xc07   :  { %v774_v18 = vadd.f32 %v773_v17, %v175_v14  ;;  %v1436_v20 = vpop.f32.mrb[17].mxu1  ;;  %v1444_v21 = vpop.f32.mrb[21].mxu0 }
 0xc08   :  { %v723_v22 = vpop.f32.mrb[18].mxu1  ;;  %v776_v23 = vpop.f32.mrb[22].mxu0 }
 0xc09   :  { %1561 = vtanh.f32 %v774_v18  ;;  %v1437_v24 = vpop.f32.mrb[19].mxu1  ;;  %v1445_v25 = vpop.f32.mrb[23].mxu0  ;;  %v1293_v27 = vmul.f32 -1.442695, %v774_v18 }
 0xc0b   :  { %1563 = vpow2.f32 %v1293_v27 }
 0xc13   :  { %v1562_v26 = vpop.eup %1561 }
 0xc14   :  { %788 = vrot.lane.b32.xlu1 %v1562_v26, %s1694_s7 }
 0xc15   :  { %v1564_v28 = vpop.eup %1563 }
 0xc16   :  { %v782_v29 = vadd.f32 1.0, %v1564_v28 }
 0xc18   :  { %1565 = vrcp.f32 %v782_v29 }
 0xc22   :  { %v1566_v41 = vpop.eup %1565 }
 0xc23   :  { %v786_v10 = vmul.f32 %v1566_v41, %v672_v6 }
 0xc86   :  { %v789_v30 = vpop.permute.xlu1 %788 }
 0xc87   :  { %v791_v31 = vmul.f32 %v1566_v41, %v789_v30 }
 0xc89   :  { %793 = vrot.lane.b32.xlu0 %v791_v31, %s1699_s3 }
 0xcfb   :  { %v794_v32 = vpop.permute.xlu0 %793 }
 0xcfc   :  { %v796_v33 = vadd.f32 %v794_v32, %v786_v10 }
 0xcfe   :  { %1567 = vtanh.f32 %v796_v33 }
 0xd08   :  { %v1568_v36 = vpop.eup %1567 }
 0xd09   :  { %799 = vrot.lane.b32.xlu1 %v1568_v36, %s1694_s7  ;;  %v186_v36 = vadd.f32 %v1840_v42, %v1803_v9 }
 0xd7b   :  { %v800_v37 = vpop.permute.xlu1 %799 }
 0xd7c   :  { %v802_v38 = vmul.f32 %v1566_v41, %v800_v37 }
 0xd7e   :  { %v803_v39 = vpack.c.bf16 %v802_v38, %v802_v38 }
 0xd80   :  { %805 = vrot.lane.b32.xlu0 %v803_v39, %s1699_s3 }
 0xdf2   :  { %v806_v44 = vpop.permute.xlu0 %805 }
 0xdf3   :  { %1451 = vmatmul.mubr.msk.bf16.vlgmr.msra.gmra.mrb[20].mxu1 %vm57_vm0, %v806_v44  ;;  %1459 = vmatmul.mubr.msk.bf16.vlgmr.msra.gmra.mrb[24].mxu0 %vm57_vm0, %v806_v44 }
 0xdf4   :  { %1471 = vmatpush3.bf16.msra.mxu0 %v1779_v2  ;;  %1463 = vmatpush3.bf16.msra.mxu1 %v1819_v34 }
 0xdf5   :  { %1472 = vmatprep.subr.bf16.mxu0 %v1697_v0  ;;  %1464 = vmatprep.subr.bf16.mxu1 %v1697_v0 }
 0xdf6   :  { %1474 = vmatprep.mubr.msk.bf16.mxu0 %vm1698_vm1, %v1697_v0  ;;  %1466 = vmatprep.mubr.msk.bf16.mxu1 %vm1698_vm1, %v1697_v0 }
 0xdf8   :  { %1473 = vmatpush3.bf16.msra.mxu0 %v1785_v4  ;;  %1465 = vmatpush3.bf16.msra.mxu1 %v1826_v35 }
 0xdf9   :  { %1486 = vmatprep.subr.bf16.mxu0 %v1697_v0  ;;  %1478 = vmatprep.subr.bf16.mxu1 %v1697_v0 }
 0xec6   :  { %v1952_v47 = vpop.f32.mrb[20].mxu1  ;;  %v897_v48 = vpop.f32.mrb[24].mxu0 }
 0xec7   :  { %v898_v49 = vadd.f32 %v897_v48, %v178_v46  ;;  %v1452_v51 = vpop.f32.mrb[21].mxu1  ;;  %v1460_v52 = vpop.f32.mrb[25].mxu0 }
 0xec8   :  { %v847_v53 = vpop.f32.mrb[22].mxu1  ;;  %v900_v54 = vpop.f32.mrb[26].mxu0 }
 0xec9   :  { %1569 = vtanh.f32 %v898_v49  ;;  %v1453_v55 = vpop.f32.mrb[23].mxu1  ;;  %v1461_v56 = vpop.f32.mrb[27].mxu0  ;;  %v1297_v58 = vmul.f32 -1.442695, %v898_v49 }
 0xeca   :  { %v473_v55 = vadd.f32 %v1861_v45, %v1886_v19 }
 0xecb   :  { %1571 = vpow2.f32 %v1297_v58 }
 0xecc   :  { %v1283_v56 = vmul.f32 -1.442695, %v473_v55 }
 0xed3   :  { %v1570_v57 = vpop.eup %1569 }
 0xed4   :  { %912 = vrot.lane.b32.xlu1 %v1570_v57, %s1694_s7  ;;  %v721_v57 = vadd.f32 %v1861_v45, %v1930_v16 }
 0xed5   :  { %v1572_v59 = vpop.eup %1571 }
 0xed6   :  { %v906_v60 = vadd.f32 1.0, %v1572_v59  ;;  %v1291_v58 = vmul.f32 -1.442695, %v721_v57 }
 0xed8   :  { %1573 = vrcp.f32 %v906_v60 }
 0xee2   :  { %v1574_v43 = vpop.eup %1573 }
 0xee3   :  { %v910_v15 = vmul.f32 %v1574_v43, %v796_v33 }
 0xf46   :  { %v913_v61 = vpop.permute.xlu1 %912 }
 0xf47   :  { %v915_v62 = vmul.f32 %v1574_v43, %v913_v61 }
 0xf49   :  { %917 = vrot.lane.b32.xlu0 %v915_v62, %s1699_s3 }
 0xfbb   :  { %v918_v63 = vpop.permute.xlu0 %917 }
 0xfbc   :  { %v920_v1 = vadd.f32 %v918_v63, %v910_v15 }
 0xfbe   :  { %1575 = vtanh.f32 %v920_v1 }
 0xfc8   :  { %v1576_v3 = vpop.eup %1575 }
 0xfc9   :  { %923 = vrot.lane.b32.xlu1 %v1576_v3, %s1694_s7 }
0x103b   :  { %v924_v5 = vpop.permute.xlu1 %923 }
0x103c   :  { %v926_v6 = vmul.f32 %v1574_v43, %v924_v5 }
0x103e   :  { %v927_v7 = vpack.c.bf16 %v926_v6, %v926_v6 }
0x1040   :  { %929 = vrot.lane.b32.xlu0 %v927_v7, %s1699_s3 }
0x10b2   :  { %v930_v8 = vpop.permute.xlu0 %929 }
0x10b3   :  { %1467 = vmatmul.mubr.msk.bf16.vlgmr.msra.gmra.mrb[24].mxu1 %vm57_vm0, %v930_v8  ;;  %1475 = vmatmul.mubr.msk.bf16.vlgmr.msra.gmra.mrb[28].mxu0 %vm57_vm0, %v930_v8 }
0x10b4   :  { %1487 = vmatpush3.bf16.msra.mxu0 %v1779_v2  ;;  %1479 = vmatpush3.bf16.msra.mxu1 %v1819_v34  ;;  %v183_v2 = vadd.f32 %v1836_v40, %v1803_v9 }
0x10b5   :  { %1488 = vmatprep.subr.bf16.mxu0 %v1697_v0  ;;  %1480 = vmatprep.subr.bf16.mxu1 %v1697_v0 }
0x10b6   :  { %1490 = vmatprep.mubr.msk.bf16.mxu0 %vm1698_vm1, %v1697_v0  ;;  %1482 = vmatprep.mubr.msk.bf16.mxu1 %vm1698_vm1, %v1697_v0 }
0x10b8   :  { %1489 = vmatpush3.bf16.msra.mxu0 %v1785_v4  ;;  %1481 = vmatpush3.bf16.msra.mxu1 %v1826_v35 }
0x10b9   :  { %1494 = vmatprep.subr.bf16.mxu1 %v1697_v0 }
0x1186   :  { %v1973_v11 = vpop.f32.mrb[24].mxu1  ;;  %v1021_v12 = vpop.f32.mrb[28].mxu0 }
0x1187   :  { %v1022_v13 = vadd.f32 %v1021_v12, %v183_v2  ;;  %v1468_v14 = vpop.f32.mrb[25].mxu1  ;;  %v1476_v17 = vpop.f32.mrb[29].mxu0  ;;  %v969_v59 = vadd.f32 %v1861_v45, %v1973_v11  ;;  %v597_v2 = vadd.f32 %v1861_v45, %v1908_v50  ;;  %v845_v12 = vadd.f32 %v1861_v45, %v1952_v47 }
0x1188   :  { %v971_v18 = vpop.f32.mrb[26].mxu1  ;;  %v1024_v20 = vpop.f32.mrb[30].mxu0 }
0x1189   :  { %1577 = vtanh.f32 %v1022_v13  ;;  %v1469_v21 = vpop.f32.mrb[27].mxu1  ;;  %v1477_v22 = vpop.f32.mrb[31].mxu0  ;;  %v1301_v4 = vmul.f32 -1.442695, %v1022_v13  ;;  %v1299_v60 = vmul.f32 -1.442695, %v969_v59 }
0x118a   :  { %v1287_v11 = vmul.f32 -1.442695, %v597_v2  ;;  %v1295_v13 = vmul.f32 -1.442695, %v845_v12 }
0x118b   :  { %1579 = vpow2.f32 %v1301_v4 }
0x1193   :  { %v1578_v23 = vpop.eup %1577 }
0x1194   :  { %1036 = vrot.lane.b32.xlu1 %v1578_v23, %s1694_s7 }
0x1195   :  { %v1580_v24 = vpop.eup %1579 }
0x1196   :  { %v1030_v25 = vadd.f32 1.0, %v1580_v24 }
0x1198   :  { %1581 = vrcp.f32 %v1030_v25 }
0x11a2   :  { %v1582_v40 = vpop.eup %1581 }
0x11a3   :  { %v1034_v28 = vmul.f32 %v1582_v40, %v920_v1 }
0x1206   :  { %v1037_v26 = vpop.permute.xlu1 %1036 }
0x1207   :  { %v1039_v27 = vmul.f32 %v1582_v40, %v1037_v26 }
0x1209   :  { %1041 = vrot.lane.b32.xlu0 %v1039_v27, %s1699_s3 }
0x127b   :  { %v1042_v29 = vpop.permute.xlu0 %1041 }
0x127c   :  { %v1044_v41 = vadd.f32 %v1042_v29, %v1034_v28 }
0x127e   :  { %1583 = vtanh.f32 %v1044_v41 }
0x1288   :  { %v1584_v30 = vpop.eup %1583 }
0x1289   :  { %1047 = vrot.lane.b32.xlu1 %v1584_v30, %s1694_s7 }
0x12fb   :  { %v1048_v31 = vpop.permute.xlu1 %1047 }
0x12fc   :  { %v1050_v10 = vmul.f32 %v1582_v40, %v1048_v31 }
0x12fe   :  { %v1051_v32 = vpack.c.bf16 %v1050_v10, %v1050_v10 }
0x1300   :  { %1053 = vrot.lane.b32.xlu0 %v1051_v32, %s1699_s3 }
0x1372   :  { %v1054_v33 = vpop.permute.xlu0 %1053 }
0x1373   :  { %1483 = vmatmul.mubr.msk.bf16.vlgmr.msra.gmra.mrb[28].mxu1 %vm57_vm0, %v1054_v33  ;;  %1491 = vmatmul.mubr.msk.bf16.vlgmr.msra.gmra.mrb[32].mxu0 %vm57_vm0, %v1054_v33 }
0x1374   :  { %1495 = vmatpush3.bf16.msra.mxu1 %v1819_v34  ;;  %1498 = vmatprep.mubr.msk.bf16.mxu1 %vm1698_vm1, %v1697_v0 }
0x1375   :  { %1496 = vmatprep.subr.bf16.mxu1 %v1697_v0 }
0x1378   :  { %1497 = vmatpush3.bf16.msra.mxu1 %v1826_v35 }
0x1446   :  { %v1092_v37 = vpop.f32.mrb[28].mxu1  ;;  %v1145_v38 = vpop.f32.mrb[32].mxu0 }
0x1447   :  { %v1146_v39 = vadd.f32 %v1145_v38, %v186_v36  ;;  %v1484_v44 = vpop.f32.mrb[29].mxu1  ;;  %v1492_v46 = vpop.f32.mrb[33].mxu0  ;;  %v1093_v14 = vadd.f32 %v1861_v45, %v1092_v37 }
0x1448   :  { %v1095_v48 = vpop.f32.mrb[30].mxu1  ;;  %v1148_v49 = vpop.f32.mrb[34].mxu0 }
0x1449   :  { %1585 = vtanh.f32 %v1146_v39  ;;  %v1485_v51 = vpop.f32.mrb[31].mxu1  ;;  %v1493_v34 = vpop.f32.mrb[35].mxu0  ;;  %v1305_v53 = vmul.f32 -1.442695, %v1146_v39  ;;  %v1303_v17 = vmul.f32 -1.442695, %v1093_v14 }
0x144b   :  { %1587 = vpow2.f32 %v1305_v53 }
0x1453   :  { %v1586_v52 = vpop.eup %1585 }
0x1454   :  { %1160 = vrot.lane.b32.xlu1 %v1586_v52, %s1694_s7 }
0x1455   :  { %v1588_v0 = vpop.eup %1587 }
0x1456   :  { %v1154_v35 = vadd.f32 1.0, %v1588_v0 }
0x1458   :  { %1589 = vrcp.f32 %v1154_v35 }
0x1459   :  { %1591 = vpow2.f32 %v1283_v56 }
0x145a   :  { %1593 = vpow2.f32 %v1291_v58 }
0x145b   :  { %1595 = vpow2.f32 %v1299_v60 }
0x1462   :  { %v1590_v54 = vpop.eup %1589 }
0x1463   :  { %v1158_v43 = vmul.f32 %v1590_v54, %v1044_v41  ;;  %v1592_v61 = vpop.eup %1591 }
0x1464   :  { %v481_v63 = vadd.f32 1.0, %v1592_v61  ;;  %v1594_v19 = vpop.eup %1593 }
0x1465   :  { %v729_v1 = vadd.f32 1.0, %v1594_v19  ;;  %v1596_v16 = vpop.eup %1595 }
0x1466   :  { %v977_v3 = vadd.f32 1.0, %v1596_v16 }
0x14c6   :  { %v1161_v9 = vpop.permute.xlu1 %1160 }
0x14c7   :  { %v1163_v42 = vmul.f32 %v1590_v54, %v1161_v9 }
0x14c9   :  { %1165 = vrot.lane.b32.xlu0 %v1163_v42, %s1699_s3 }
0x153b   :  { %v1166_v62 = vpop.permute.xlu0 %1165 }
0x153c   :  { %v1996_v15 = vadd.f32 %v1166_v62, %v1158_v43 }
0x153e   :  { %1597 = vtanh.f32 %v1996_v15 }
0x153f   :  { %1599 = vrcp.f32 %v481_v63 }
0x1540   :  { %1601 = vrcp.f32 %v729_v1 }
0x1541   :  { %1603 = vrcp.f32 %v977_v3 }
0x1542   :  { %1605 = vpow2.f32 %v1287_v11 }
0x1543   :  { %1607 = vpow2.f32 %v1295_v13 }
0x1544   :  { %1609 = vpow2.f32 %v1303_v17 }
0x1548   :  { %v1598_v5 = vpop.eup %1597 }
0x1549   :  { %1171 = vrot.lane.b32.xlu1 %v1598_v5, %s1694_s7  ;;  %v1600_v6 = vpop.eup %1599 }
0x154a   :  { %v1602_v7 = vpop.eup %1601 }
0x154b   :  { %v1604_v8 = vpop.eup %1603 }
0x154c   :  { %v1606_v18 = vpop.eup %1605 }
0x154d   :  { %485 = vrot.lane.b32.xlu1 %v1600_v6, %s1700_s5  ;;  %v605_v20 = vadd.f32 1.0, %v1606_v18  ;;  %v1608_v21 = vpop.eup %1607 }
0x154e   :  { %v853_v22 = vadd.f32 1.0, %v1608_v21  ;;  %v1610_v23 = vpop.eup %1609 }
0x154f   :  { %1611 = vrcp.f32 %v605_v20  ;;  %v1101_v50 = vadd.f32 1.0, %v1610_v23 }
0x1550   :  { %1613 = vrcp.f32 %v853_v22 }
0x1551   :  { %733 = vrot.lane.b32.xlu1 %v1602_v7, %s1701_s8  ;;  %1615 = vrcp.f32 %v1101_v50 }
0x1555   :  { %981 = vrot.lane.b32.xlu1 %v1604_v8, %s1702_s9 }
0x1559   :  { %v1612_v40 = vpop.eup %1611 }
0x155a   :  { %v1614_v26 = vpop.eup %1613 }
0x155b   :  { %v1616_v27 = vpop.eup %1615 }
0x15bb   :  { %v1172_v4 = vpop.permute.xlu1 %1171 }
0x15bc   :  { %v1174_v24 = vmul.f32 %v1590_v54, %v1172_v4 }
0x15be   :  { %v1175_v25 = vpack.c.bf16 %v1174_v24, %v1174_v24 }
0x15bf   :  { %v486_v47 = vpop.permute.xlu1 %485 }
0x15c0   :  { %489 = vst.msk [vmem:[#allocation10] sm:$0xff] %vm488_vm3, %v486_v47  ;;  %1177 = vrot.lane.b32.xlu0 %v1175_v25, %s1699_s3 }
0x15c3   :  { %v734_v29 = vpop.permute.xlu1 %733 }
0x15c4   :  { %609 = vrot.lane.b32.xlu0 %v1612_v40, %s1699_s3 }
0x15c7   :  { %v982_v31 = vpop.permute.xlu1 %981 }
0x15c8   :  { %857 = vrot.lane.b32.xlu0 %v1614_v26, %s1694_s7  ;;  %s1704_s7 = smov 112  }
0x15cc   :  { %1105 = vrot.lane.b32.xlu0 %v1616_v27, %s1703_s10 }
0x15d0   :  { %1235 = vrot.lane.b32.xlu0 %v1174_v24, %s1699_s3 }
0x1632   :  { %v1178_v28 = vpop.permute.xlu0 %1177 }
0x1633   :  { %1499 = vmatmul.mubr.msk.bf16.vlgmr.msra.gmra.mrb[32].mxu1 %vm57_vm0, %v1178_v28 }
0x1636   :  { %v610_v41 = vpop.permute.xlu0 %609 }
0x1637   :  { %613 = vst.msk [vmem:[#allocation10] sm:$0xff] %vm612_vm4, %v610_v41 }
0x1638   :  { %737 = vst.msk [vmem:[#allocation10] sm:$0xff] %vm736_vm5, %v734_v29 }
0x163a   :  { %v858_v30 = vpop.permute.xlu0 %857 }
0x163b   :  { %861 = vst.msk [vmem:[#allocation10] sm:$0xff] %vm860_vm6, %v858_v30 }
0x163c   :  { %985 = vst.msk [vmem:[#allocation10] sm:$0xff] %vm984_vm7, %v982_v31 }
0x163e   :  { %v1106_v10 = vpop.permute.xlu0 %1105 }
0x163f   :  { %1109 = vst.msk [vmem:[#allocation10] sm:$0xff] %vm1108_vm8, %v1106_v10 }
0x1642   :  { %v1236_v32 = vpop.permute.xlu0 %1235 }
0x1643   :  { %1238 = vst.msk [vmem:[#allocation3] sm:$0xff] %vm57_vm0, %v1236_v32 }
0x1706   :  { %v1216_v33 = vpop.f32.mrb[32].mxu1 }
0x1707   :  { %v1217_v36 = vadd.f32 %v1861_v45, %v1216_v33  ;;  %v1500_v37 = vpop.f32.mrb[33].mxu1 }
0x1708   :  { %v1219_v38 = vpop.f32.mrb[34].mxu1 }
0x1709   :  { %v1307_v39 = vmul.f32 -1.442695, %v1217_v36  ;;  %v1501_v44 = vpop.f32.mrb[35].mxu1 }
0x170b   :  { %1617 = vpow2.f32 %v1307_v39 }
0x1715   :  { %v1618_v46 = vpop.eup %1617 }
0x1716   :  { %v1225_v48 = vadd.f32 1.0, %v1618_v46 }
0x1718   :  { %1619 = vrcp.f32 %v1225_v48 }
0x1722   :  { %v1620_v49 = vpop.eup %1619 }
0x1723   :  { %1229 = vrot.lane.b32.xlu1 %v1620_v49, %s1704_s7 }
0x1727   :  { %1240 = vrot.lane.b32.xlu1 %v1996_v15, %s1703_s10 }
0x1795   :  { %v1230_v51 = vpop.permute.xlu1 %1229 }
0x1796   :  { %1233 = vst.msk [vmem:[#allocation10] sm:$0xff] %vm1232_vm9, %v1230_v51 }
0x1797   :  { %1676 = shalt.err (!%p1673_p6)
}
0x1798   :  { %s1677_s16 = scalar_lea.hbm %s2034_s6, 128 }
0x1799   :  { %p1678_p7 = scmp.ne.s32.totalorder %s2034_s6, %s1677_s16  ;;  %p1681_p8 = scmp.lt.u32.totalorder %s1677_s16, %s2034_s6 }
0x179b   :  { %p1683_p9 = pnand %p1681_p8, %p1678_p7 }
0x179d   :  { %1686 = shalt.err (!%p1683_p9)
}
0x179e   :  { %1253 = dma.vmem_to_hbm [thread:$0]  %s1251_s12, 128, %s2034_s6, [#allocation7]   ;;  %v1241_v45 = vpop.permute.xlu1 %1240 }
0x179f   :  { %1243 = vst.msk [vmem:[#allocation4] sm:$0xff] %vm57_vm0, %v1241_v45 }
0x17a0   :  { %1691 = dma.done.wait [#allocation7], 128  }
0x17a1   :  { %1692 = vsyncadd [#allocation7], 4294967168 }
0x17a2   :  { %1257 = vsyncpa [#allocation6], 1 }
0x17a3   :  { %1258 = vsyncpa [#allocation9], 1 }
0x17a4   :  { %1259 = vsyncpa [#allocation7], 1 }

</bundles_post_ra>
